<compile_context>
chip_gen: v5e
topology: v5e:2x2
jax: 0.10.0
libtpu: 0.0.40
codegen_flags: <defaults>
</compile_context>

<pallas_src>
import numpy as np
import jax
import jax.numpy as jnp
from jax import lax
from jax.experimental import pallas as pl
from jax.experimental.pallas import tpu as pltpu

# Small shapes consistent with the module (hd_dimension -> D, nn_hidden_dim -> H)
D = 128            # hd_dimension (small, lane width)
H = 64             # nn_hidden_dim
N_MAX = 8          # ring-buffer slots (>= max samples inside the temporal window)
B = 16             # agents processed together (batched swarm)
TEMPORAL_WINDOW = 1.0
DECAY_RATE = 0.1
ALPHA = 0.7
# Padded (empty) slots are always outside the window; exp(-rate*(t - PAD_TIME)) underflows
# cleanly to 0 in f32 and is additionally zeroed by the valid mask.
PAD_TIME = -1e30


def _temporal_kernel(step0_ref, ts_ref, b2_ref, init_samples_ref, init_times_ref,
                     xs_ref, w1_ref, b1_ref, w2r_ref,
                     out_ref, samples_ref, times_ref):
    s = pl.program_id(0)
    t = ts_ref[s]
    b2 = b2_ref[0]
    slot = (step0_ref[0] + s) % N_MAX

    # Ring-buffer state lives in the resident output blocks (constant index_map over the
    # step grid -> stays in VMEM across steps, written back to HBM once at the end).
    @pl.when(s == 0)
    def _():
        samples_ref[...] = init_samples_ref[...]
        times_ref[...] = init_times_ref[...]

    x = xs_ref[0]                                                    # (B, D) new samples

    # "append(t, x)": slot-major ring — only B rows of the slab are stored.
    samples_ref[slot] = x
    slot_iota = lax.broadcasted_iota(jnp.int32, (N_MAX, 1, 1), 0)
    times_ref[...] = jnp.where(slot_iota == slot, t, times_ref[...])

    S = samples_ref[...]                                             # (N_MAX, B, D)
    times = times_ref[...]                                           # (N_MAX, 1, 1)

    # temporal-window mask + exponential decay weights (padded/stale slots -> 0)
    cutoff = t - TEMPORAL_WINDOW
    valid = (times > cutoff).astype(jnp.float32)                     # (N_MAX, 1, 1)
    decay_w = jnp.exp(-DECAY_RATE * (t - times)) * valid             # (N_MAX, 1, 1)
    n_valid = jnp.sum(valid, axis=0)                                 # (1, 1) samples / agent

    # attention = Linear(D,H) -> ReLU -> Linear(H,1) -> Sigmoid over all ring rows
    # (stale/padded rows are computed too but masked out by `valid` below).
    # bf16 matmul inputs (v6e/v7x native MXU dtype), f32 accumulation + elementwise math.
    S2 = S.reshape(N_MAX * B, D)                                     # (128, 128): tile-aligned merge
    h = jnp.dot(S2.astype(jnp.bfloat16), w1_ref[...].astype(jnp.bfloat16),
                preferred_element_type=jnp.float32) + b1_ref[...]    # (N_MAX*B, H) single MXU op
    h = jnp.maximum(h, 0.0)
    logits = jnp.sum(h * w2r_ref[...], axis=-1, keepdims=True) + b2  # (N_MAX*B, 1) VPU + lane reduce
    attn = jax.nn.sigmoid(logits).reshape(N_MAX, B, 1)

    # (samples * attention_weights).mean(dim=0) over the window, per agent
    inv_n = pl.reciprocal(jnp.maximum(n_valid, 1.0), approx=True)    # EUP reciprocal
    weighted_mean = jnp.sum(S * (attn * valid), axis=0) * inv_n      # (B, D) leading-axis VPU sum

    # sum_{buffer[:-1]} exp(-decay_rate*(t - t_i)) * (x_i - x): the current slot's row of S
    # equals x, so it contributes exactly 0 — matches the PyTorch `time_buffer[:-1]` loop.
    dsum = jnp.sum((S - x[None, :, :]) * decay_w, axis=0)            # (B, D)

    combined = ALPHA * dsum + (1.0 - ALPHA) * weighted_mean
    # if len(time_buffer) <= 1: return x
    out_ref[0] = jnp.where(n_valid > 1.5, combined, x)


@jax.jit
def _run_kernel(step0, ts, b2, samples, times, xs, w1, b1, w2r):
    T = xs.shape[0]
    return pl.pallas_call(
        _temporal_kernel,
        grid=(T,),
        out_shape=(jax.ShapeDtypeStruct((T, B, D), jnp.float32),
                   jax.ShapeDtypeStruct((N_MAX, B, D), jnp.float32),
                   jax.ShapeDtypeStruct((N_MAX, 1, 1), jnp.float32)),
        in_specs=[
            pl.BlockSpec(memory_space=pltpu.MemorySpace.SMEM),       # step0  (1,)  int32
            pl.BlockSpec(memory_space=pltpu.MemorySpace.SMEM),       # ts     (T,)  f32
            pl.BlockSpec(memory_space=pltpu.MemorySpace.SMEM),       # b2     (1,)  f32
            pl.BlockSpec((N_MAX, B, D), lambda s: (0, 0, 0)),        # initial ring samples (aliased)
            pl.BlockSpec((N_MAX, 1, 1), lambda s: (0, 0, 0)),        # initial slot times   (aliased)
            pl.BlockSpec((1, B, D), lambda s: (s, 0, 0)),            # xs streamed per step
            pl.BlockSpec((D, H), lambda s: (0, 0)),                  # w1 (VMEM-resident)
            pl.BlockSpec((1, H), lambda s: (0, 0)),                  # b1
            pl.BlockSpec((1, H), lambda s: (0, 0)),                  # w2 row
        ],
        out_specs=(
            pl.BlockSpec((1, B, D), lambda s: (s, 0, 0)),            # per-step outputs (16,128) dense
            pl.BlockSpec((N_MAX, B, D), lambda s: (0, 0, 0)),        # final ring samples (resident)
            pl.BlockSpec((N_MAX, 1, 1), lambda s: (0, 0, 0)),        # final slot times   (resident)
        ),
        input_output_aliases={3: 1, 4: 2},                           # state buffers updated in place
        compiler_params=pltpu.CompilerParams(dimension_semantics=("arbitrary",)),
    )(step0, ts, b2, samples, times, xs, w1, b1, w2r)


class NeuralTemporalProcessorPallas:
    """Batched (B agents) stateful wrapper mimicking the PyTorch module.

    The sample ring buffer AND slot timestamps stay on device (aliased outputs); the host
    only keeps a tiny timestamp mirror for the ring-overflow sanity check.
    """

    def __init__(self, key):
        k1, k2, k3, k4 = jax.random.split(key, 4)
        bound1 = 1.0 / np.sqrt(D)      # PyTorch nn.Linear default init range
        bound2 = 1.0 / np.sqrt(H)
        self.w1 = jax.random.uniform(k1, (D, H), jnp.float32, -bound1, bound1)
        self.b1 = jax.random.uniform(k2, (1, H), jnp.float32, -bound1, bound1)
        self.w2r = jax.random.uniform(k3, (1, H), jnp.float32, -bound2, bound2)  # Linear(H,1).weight
        self.b2 = jax.random.uniform(k4, (1,), jnp.float32, -bound2, bound2)
        self.samples = jnp.zeros((N_MAX, B, D), jnp.float32)          # device-resident ring buffer
        self.times = jnp.full((N_MAX, 1, 1), PAD_TIME, jnp.float32)   # device-resident slot times
        self.step = 0
        self._slot_times = np.full((N_MAX,), PAD_TIME, np.float32)    # host mirror (sanity check only)

    def forward_trajectory(self, ts, xs):
        """ts: (T,) timestamps (shared by all agents); xs: (T, B, D) f32 -> (T, B, D) f32."""
        ts_np = np.asarray(ts, np.float32).reshape(-1)
        xs = jnp.asarray(xs, jnp.float32).reshape(ts_np.shape[0], B, D)
        for i, t in enumerate(ts_np):
            slot = (self.step + i) % N_MAX
            # The evicted entry must already be outside the window (the module's list filter
            # would have dropped it); otherwise the fixed-size ring would lose live data.
            assert self._slot_times[slot] <= t - TEMPORAL_WINDOW + 1e-6, \
                "ring-buffer overflow: more than N_MAX samples inside the temporal window"
            self._slot_times[slot] = t
        out, self.samples, self.times = _run_kernel(
            jnp.asarray([self.step], jnp.int32),
            jnp.asarray(ts_np),
            self.b2, self.samples, self.times, xs,
            self.w1, self.b1, self.w2r,
        )
        self.step += ts_np.shape[0]
        return out

    def __call__(self, t, x):
        """Single-step API matching the PyTorch module: x (B, D) -> (B, D)."""
        return self.forward_trajectory(np.asarray([t], np.float32),
                                       jnp.asarray(x, jnp.float32)[None])[0]


def _reference_forward(t, history, x, w1, b1, w2r, b2):
    """Per-agent numpy (float64) transcription of the PyTorch forward for validation."""
    Bn, Dn = x.shape
    out = x.astype(np.float64).copy()
    if len(history) > 1:
        for a in range(Bn):
            S = np.stack([Xi[a] for _, Xi in history]).astype(np.float64)   # (k, D)
            h = np.maximum(S @ w1 + b1, 0.0)
            attw = 1.0 / (1.0 + np.exp(-(h @ w2r.T + b2)))                  # (k, 1)
            weighted = (S * attw).mean(axis=0)
            decay = np.zeros(Dn, np.float64)
            for ti, Xi in history[:-1]:
                decay += np.exp(-DECAY_RATE * (t - ti)) * (
                    Xi[a].astype(np.float64) - x[a].astype(np.float64))
            out[a] = ALPHA * decay + (1.0 - ALPHA) * weighted
    return out


if __name__ == "__main__":
    key = jax.random.PRNGKey(0)
    pkey, dkey = jax.random.split(key)
    proc = NeuralTemporalProcessorPallas(pkey)

    T = 10
    dt = 0.3
    ts = np.arange(T, dtype=np.float32) * dt
    xs = jax.random.normal(dkey, (T, B, D), jnp.float32)

    # Whole trajectory in one pallas_call (dispatch amortized over T steps).
    outs = jax.block_until_ready(proc.forward_trajectory(ts, xs))
    outs_np = np.asarray(outs, np.float64)

    w1_64 = np.asarray(proc.w1, np.float64)
    b1_64 = np.asarray(proc.b1, np.float64)
    w2r_64 = np.asarray(proc.w2r, np.float64)
    b2_64 = np.asarray(proc.b2, np.float64)

    history = []   # host mirror of the module's time_buffer (used only by the reference)
    for s in range(T):
        t = float(ts[s])
        x_np = np.asarray(xs[s], np.float32)
        history.append((t, x_np))
        history = [(ti, xi) for ti, xi in history if ti > t - TEMPORAL_WINDOW]
        ref = _reference_forward(t, history, x_np, w1_64, b1_64, w2r_64, b2_64)
        np.testing.assert_allclose(outs_np[s], ref, rtol=2e-3, atol=2e-3)

    # Stateful single-step path: ring state carried on-device across pallas_calls.
    out = None
    for s in range(T, T + 3):
        t = s * dt
        x = jax.random.normal(jax.random.fold_in(dkey, s), (B, D), jnp.float32)
        out = proc(t, x)
        x_np = np.asarray(x, np.float32)
        history.append((t, x_np))
        history = [(ti, xi) for ti, xi in history if ti > t - TEMPORAL_WINDOW]
        ref = _reference_forward(t, history, x_np, w1_64, b1_64, w2r_64, b2_64)
        np.testing.assert_allclose(np.asarray(out, np.float64), ref, rtol=2e-3, atol=2e-3)

    jax.block_until_ready(out)
    print("KERNEL_OK")
</pallas_src>

<mosaic_0001>
module attributes {stable_mosaic.version = 11 : i64} {
  func.func @_temporal_kernel(%arg0: i32, %arg1: memref<1xi32, #tpu.memory_space<smem>>, %arg2: memref<10xf32, #tpu.memory_space<smem>>, %arg3: memref<1xf32, #tpu.memory_space<smem>>, %arg4: memref<8x16x128xf32, #tpu.memory_space<vmem>>, %arg5: memref<8x1x1xf32, #tpu.memory_space<vmem>>, %arg6: memref<1x16x128xf32, #tpu.memory_space<vmem>>, %arg7: memref<128x64xf32, #tpu.memory_space<vmem>>, %arg8: memref<1x64xf32, #tpu.memory_space<vmem>>, %arg9: memref<1x64xf32, #tpu.memory_space<vmem>>, %arg10: memref<1x16x128xf32, #tpu.memory_space<vmem>>, %arg11: memref<8x16x128xf32, #tpu.memory_space<vmem>>, %arg12: memref<8x1x1xf32, #tpu.memory_space<vmem>>) attributes {dimension_semantics = [#tpu.dimension_semantics<arbitrary>], iteration_bounds = array<i64: 10>, scalar_prefetch = 0 : i64, scratch_operands = 0 : i64, tpu.core_type = #tpu.core_type<tc>, window_params = [{transform_indices = @transform_0, window_bounds = array<i64: 1>}, {transform_indices = @transform_1, window_bounds = array<i64: 10>}, {transform_indices = @transform_2, window_bounds = array<i64: 1>}, {pipeline_mode = #tpu.pipeline_mode<synchronous>, transform_indices = @transform_3, window_bounds = array<i64: 8, 16, 128>}, {pipeline_mode = #tpu.pipeline_mode<synchronous>, transform_indices = @transform_4, window_bounds = array<i64: 8, 1, 1>}, {transform_indices = @transform_5, window_bounds = array<i64: 1, 16, 128>}, {pipeline_mode = #tpu.pipeline_mode<synchronous>, transform_indices = @transform_6, window_bounds = array<i64: 128, 64>}, {pipeline_mode = #tpu.pipeline_mode<synchronous>, transform_indices = @transform_7, window_bounds = array<i64: 1, 64>}, {pipeline_mode = #tpu.pipeline_mode<synchronous>, transform_indices = @transform_8, window_bounds = array<i64: 1, 64>}, {transform_indices = @transform_9, window_bounds = array<i64: 1, 16, 128>}, {pipeline_mode = #tpu.pipeline_mode<synchronous>, transform_indices = @transform_10, window_bounds = array<i64: 8, 16, 128>}, {pipeline_mode = #tpu.pipeline_mode<synchronous>, transform_indices = @transform_11, window_bounds = array<i64: 8, 1, 1>}]} {
    %0 = arith.index_cast %arg0 : i32 to index
    %1 = memref.load %arg2[%0] : memref<10xf32, #tpu.memory_space<smem>>
    %c0 = arith.constant 0 : index
    %2 = memref.load %arg3[%c0] : memref<1xf32, #tpu.memory_space<smem>>
    %c0_0 = arith.constant 0 : index
    %3 = memref.load %arg1[%c0_0] : memref<1xi32, #tpu.memory_space<smem>>
    %4 = arith.addi %3, %arg0 : i32
    %c8_i32 = arith.constant 8 : i32
    %c0_i32 = arith.constant 0 : i32
    %5 = arith.cmpi eq, %c8_i32, %c0_i32 : i32
    %c1_i32 = arith.constant 1 : i32
    %6 = arith.select %5, %c1_i32, %c8_i32 : i32
    %7 = arith.remsi %4, %6 : i32
    %c0_i32_1 = arith.constant 0 : i32
    %8 = arith.cmpi ne, %7, %c0_i32_1 : i32
    %c0_i32_2 = arith.constant 0 : i32
    %9 = arith.cmpi slt, %7, %c0_i32_2 : i32
    %c0_i32_3 = arith.constant 0 : i32
    %10 = arith.cmpi slt, %6, %c0_i32_3 : i32
    %11 = arith.xori %9, %10 : i1
    %12 = arith.andi %11, %8 : i1
    %13 = arith.addi %7, %6 : i32
    %14 = arith.select %12, %13, %7 : i32
    %c0_i32_4 = arith.constant 0 : i32
    %15 = arith.cmpi eq, %arg0, %c0_i32_4 : i32
    %16 = arith.extui %15 : i1 to i32
    %c0_i32_5 = arith.constant 0 : i32
    %17 = arith.cmpi ne, %16, %c0_i32_5 : i32
    scf.if %17 {
      %c0_44 = arith.constant 0 : index
      %c0_45 = arith.constant 0 : index
      %c0_46 = arith.constant 0 : index
      %97 = vector.load %arg4[%c0_44, %c0_45, %c0_46] : memref<8x16x128xf32, #tpu.memory_space<vmem>>, vector<8x16x128xf32>
      %c0_47 = arith.constant 0 : index
      %c0_48 = arith.constant 0 : index
      %c0_49 = arith.constant 0 : index
      %98 = vector.load %arg11[%c0_47, %c0_48, %c0_49] : memref<8x16x128xf32, #tpu.memory_space<vmem>>, vector<8x16x128xf32>
      tpu.vector_store %arg11[%c0_47, %c0_48, %c0_49], %97 {strides = array<i32>} : memref<8x16x128xf32, #tpu.memory_space<vmem>>, vector<8x16x128xf32>,
      %c0_50 = arith.constant 0 : index
      %c0_51 = arith.constant 0 : index
      %c0_52 = arith.constant 0 : index
      %99 = vector.load %arg5[%c0_50, %c0_51, %c0_52] : memref<8x1x1xf32, #tpu.memory_space<vmem>>, vector<8x1x1xf32>
      %c0_53 = arith.constant 0 : index
      %c0_54 = arith.constant 0 : index
      %c0_55 = arith.constant 0 : index
      %100 = vector.load %arg12[%c0_53, %c0_54, %c0_55] : memref<8x1x1xf32, #tpu.memory_space<vmem>>, vector<8x1x1xf32>
      tpu.vector_store %arg12[%c0_53, %c0_54, %c0_55], %99 {strides = array<i32>} : memref<8x1x1xf32, #tpu.memory_space<vmem>>, vector<8x1x1xf32>,
    } else {
    }
    %c0_6 = arith.constant 0 : index
    %c0_7 = arith.constant 0 : index
    %c0_8 = arith.constant 0 : index
    %18 = vector.load %arg6[%c0_6, %c0_7, %c0_8] : memref<1x16x128xf32, #tpu.memory_space<vmem>>, vector<1x16x128xf32>
    %19 = vector.shape_cast %18 : vector<1x16x128xf32> to vector<16x128xf32>
    %20 = arith.index_cast %14 : i32 to index
    %c0_9 = arith.constant 0 : index
    %c0_10 = arith.constant 0 : index
    %21 = vector.load %arg11[%20, %c0_9, %c0_10] : memref<8x16x128xf32, #tpu.memory_space<vmem>>, vector<1x16x128xf32>
    %22 = vector.shape_cast %21 : vector<1x16x128xf32> to vector<16x128xf32>
    %23 = vector.shape_cast %19 : vector<16x128xf32> to vector<1x16x128xf32>
    tpu.vector_store %arg11[%20, %c0_9, %c0_10], %23 {strides = array<i32>} : memref<8x16x128xf32, #tpu.memory_space<vmem>>, vector<1x16x128xf32>,
    %24 = tpu.iota {dimensions = array<i32: 0>} : vector<8x1x1xi32>
    %25 = vector.broadcast %14 : i32 to vector<8x1x1xi32>
    %26 = arith.cmpi eq, %24, %25 : vector<8x1x1xi32>
    %c0_11 = arith.constant 0 : index
    %c0_12 = arith.constant 0 : index
    %c0_13 = arith.constant 0 : index
    %27 = vector.load %arg12[%c0_11, %c0_12, %c0_13] : memref<8x1x1xf32, #tpu.memory_space<vmem>>, vector<8x1x1xf32>
    %28 = vector.broadcast %1 : f32 to vector<8x1x1xf32>
    %29 = arith.select %26, %28, %27 : vector<8x1x1xi1>, vector<8x1x1xf32>
    %c0_14 = arith.constant 0 : index
    %c0_15 = arith.constant 0 : index
    %c0_16 = arith.constant 0 : index
    %30 = vector.load %arg12[%c0_14, %c0_15, %c0_16] : memref<8x1x1xf32, #tpu.memory_space<vmem>>, vector<8x1x1xf32>
    tpu.vector_store %arg12[%c0_14, %c0_15, %c0_16], %29 {strides = array<i32>} : memref<8x1x1xf32, #tpu.memory_space<vmem>>, vector<8x1x1xf32>,
    %c0_17 = arith.constant 0 : index
    %c0_18 = arith.constant 0 : index
    %c0_19 = arith.constant 0 : index
    %31 = vector.load %arg11[%c0_17, %c0_18, %c0_19] : memref<8x16x128xf32, #tpu.memory_space<vmem>>, vector<8x16x128xf32>
    %c0_20 = arith.constant 0 : index
    %c0_21 = arith.constant 0 : index
    %c0_22 = arith.constant 0 : index
    %32 = vector.load %arg12[%c0_20, %c0_21, %c0_22] : memref<8x1x1xf32, #tpu.memory_space<vmem>>, vector<8x1x1xf32>
    %cst = arith.constant 1.000000e+00 : f32
    %33 = arith.subf %1, %cst : f32
    %34 = vector.broadcast %33 : f32 to vector<8x1x1xf32>
    %35 = arith.cmpf ogt, %32, %34 : vector<8x1x1xf32>
    %36 = arith.extui %35 : vector<8x1x1xi1> to vector<8x1x1xi32>
    %37 = arith.sitofp %36 : vector<8x1x1xi32> to vector<8x1x1xf32>
    %38 = vector.broadcast %1 : f32 to vector<8x1x1xf32>
    %39 = arith.subf %38, %32 : vector<8x1x1xf32>
    %cst_23 = arith.constant -1.000000e-01 : f32
    %40 = vector.broadcast %cst_23 : f32 to vector<8x1x1xf32>
    %41 = arith.mulf %40, %39 : vector<8x1x1xf32>
    %42 = math.exp %41 : vector<8x1x1xf32>
    %43 = arith.mulf %42, %37 : vector<8x1x1xf32>
    %cst_24 = arith.constant dense<0.000000e+00> : vector<1x1xf32>
    %44 = vector.multi_reduction <add>, %37, %cst_24 [0] : vector<8x1x1xf32> to vector<1x1xf32>
    %45 = vector.shape_cast %31 : vector<8x16x128xf32> to vector<128x128xf32>
    %46 = arith.truncf %45 : vector<128x128xf32> to vector<128x128xbf16>
    %c0_25 = arith.constant 0 : index
    %c0_26 = arith.constant 0 : index
    %47 = vector.load %arg7[%c0_25, %c0_26] : memref<128x64xf32, #tpu.memory_space<vmem>>, vector<128x64xf32>
    %48 = arith.truncf %47 : vector<128x64xf32> to vector<128x64xbf16>
    %cst_27 = arith.constant dense<0.000000e+00> : vector<128x64xf32>
    %49 = tpu.matmul %46, %48, %cst_27 {dimension_numbers = #tpu.dot_dimension_numbers<[1], [0], [0], [1], [0, 0, 1, 1], [], []>} : vector<128x128xbf16>, vector<128x64xbf16>, vector<128x64xf32> -> vector<128x64xf32>
    %c0_28 = arith.constant 0 : index
    %c0_29 = arith.constant 0 : index
    %50 = vector.load %arg8[%c0_28, %c0_29] : memref<1x64xf32, #tpu.memory_space<vmem>>, vector<1x64xf32>
    %51 = vector.broadcast %50 : vector<1x64xf32> to vector<128x64xf32>
    %52 = arith.addf %49, %51 : vector<128x64xf32>
    %cst_30 = arith.constant 0.000000e+00 : f32
    %53 = vector.broadcast %cst_30 : f32 to vector<128x64xf32>
    %54 = arith.maximumf %52, %53 : vector<128x64xf32>
    %c0_31 = arith.constant 0 : index
    %c0_32 = arith.constant 0 : index
    %55 = vector.load %arg9[%c0_31, %c0_32] : memref<1x64xf32, #tpu.memory_space<vmem>>, vector<1x64xf32>
    %56 = vector.broadcast %55 : vector<1x64xf32> to vector<128x64xf32>
    %57 = arith.mulf %54, %56 : vector<128x64xf32>
    %cst_33 = arith.constant dense<0.000000e+00> : vector<128xf32>
    %58 = vector.multi_reduction <add>, %57, %cst_33 [1] : vector<128x64xf32> to vector<128xf32>
    %59 = vector.shape_cast %58 : vector<128xf32> to vector<128x1xf32>
    %60 = vector.broadcast %2 : f32 to vector<128x1xf32>
    %61 = arith.addf %59, %60 : vector<128x1xf32>
    %62 = arith.negf %61 : vector<128x1xf32>
    %63 = math.exp %62 : vector<128x1xf32>
    %cst_34 = arith.constant 1.000000e+00 : f32
    %64 = vector.broadcast %cst_34 : f32 to vector<128x1xf32>
    %65 = arith.addf %64, %63 : vector<128x1xf32>
    %66 = arith.divf %64, %65 : vector<128x1xf32>
    %67 = vector.shape_cast %66 : vector<128x1xf32> to vector<8x16x1xf32>
    %cst_35 = arith.constant 1.000000e+00 : f32
    %68 = vector.broadcast %cst_35 : f32 to vector<1x1xf32>
    %69 = arith.maximumf %44, %68 : vector<1x1xf32>
    %70 = tpu.reciprocal %69 {approx = true} : vector<1x1xf32> -> vector<1x1xf32>
    %71 = vector.broadcast %37 : vector<8x1x1xf32> to vector<8x16x1xf32>
    %72 = arith.mulf %67, %71 : vector<8x16x1xf32>
    %73 = vector.broadcast %72 : vector<8x16x1xf32> to vector<8x16x128xf32>
    %74 = arith.mulf %31, %73 : vector<8x16x128xf32>
    %cst_36 = arith.constant dense<0.000000e+00> : vector<16x128xf32>
    %75 = vector.multi_reduction <add>, %74, %cst_36 [0] : vector<8x16x128xf32> to vector<16x128xf32>
    %76 = vector.broadcast %70 : vector<1x1xf32> to vector<16x128xf32>
    %77 = arith.mulf %75, %76 : vector<16x128xf32>
    %78 = vector.shape_cast %19 : vector<16x128xf32> to vector<1x16x128xf32>
    %79 = vector.broadcast %78 : vector<1x16x128xf32> to vector<8x16x128xf32>
    %80 = arith.subf %31, %79 : vector<8x16x128xf32>
    %81 = vector.broadcast %43 : vector<8x1x1xf32> to vector<8x16x128xf32>
    %82 = arith.mulf %80, %81 : vector<8x16x128xf32>
    %cst_37 = arith.constant dense<0.000000e+00> : vector<16x128xf32>
    %83 = vector.multi_reduction <add>, %82, %cst_37 [0] : vector<8x16x128xf32> to vector<16x128xf32>
    %cst_38 = arith.constant 0.699999988 : f32
    %84 = vector.broadcast %cst_38 : f32 to vector<16x128xf32>
    %85 = arith.mulf %84, %83 : vector<16x128xf32>
    %cst_39 = arith.constant 3.000000e-01 : f32
    %86 = vector.broadcast %cst_39 : f32 to vector<16x128xf32>
    %87 = arith.mulf %86, %77 : vector<16x128xf32>
    %88 = arith.addf %85, %87 : vector<16x128xf32>
    %cst_40 = arith.constant 1.500000e+00 : f32
    %89 = vector.broadcast %cst_40 : f32 to vector<1x1xf32>
    %90 = arith.cmpf ogt, %44, %89 : vector<1x1xf32>
    %91 = vector.shape_cast %90 : vector<1x1xi1> to vector<1x1xi1>
    %92 = vector.broadcast %91 : vector<1x1xi1> to vector<16x128xi1>
    %93 = arith.select %92, %88, %19 : vector<16x128xi1>, vector<16x128xf32>
    %c0_41 = arith.constant 0 : index
    %c0_42 = arith.constant 0 : index
    %c0_43 = arith.constant 0 : index
    %94 = vector.load %arg10[%c0_41, %c0_42, %c0_43] : memref<1x16x128xf32, #tpu.memory_space<vmem>>, vector<1x16x128xf32>
    %95 = vector.shape_cast %94 : vector<1x16x128xf32> to vector<16x128xf32>
    %96 = vector.shape_cast %93 : vector<16x128xf32> to vector<1x16x128xf32>
    tpu.vector_store %arg10[%c0_41, %c0_42, %c0_43], %96 {strides = array<i32>} : memref<1x16x128xf32, #tpu.memory_space<vmem>>, vector<1x16x128xf32>,
    return
  }
  func.func @transform_0(%arg0: i32) -> i32 {
    %c0_i32 = arith.constant 0 : i32
    %c0_i32_0 = arith.constant 0 : i32
    return %c0_i32 : i32
  }
  func.func @transform_1(%arg0: i32) -> i32 {
    %c0_i32 = arith.constant 0 : i32
    %c0_i32_0 = arith.constant 0 : i32
    return %c0_i32 : i32
  }
  func.func @transform_2(%arg0: i32) -> i32 {
    %c0_i32 = arith.constant 0 : i32
    %c0_i32_0 = arith.constant 0 : i32
    return %c0_i32 : i32
  }
  func.func @transform_3(%arg0: i32) -> (i32, i32, i32) {
    %c0_i32 = arith.constant 0 : i32
    %c0_i32_0 = arith.constant 0 : i32
    %c0_i32_1 = arith.constant 0 : i32
    %c0_i32_2 = arith.constant 0 : i32
    return %c0_i32, %c0_i32_0, %c0_i32_1 : i32, i32, i32
  }
  func.func @transform_4(%arg0: i32) -> (i32, i32, i32) {
    %c0_i32 = arith.constant 0 : i32
    %c0_i32_0 = arith.constant 0 : i32
    %c0_i32_1 = arith.constant 0 : i32
    %c0_i32_2 = arith.constant 0 : i32
    return %c0_i32, %c0_i32_0, %c0_i32_1 : i32, i32, i32
  }
  func.func @transform_5(%arg0: i32) -> (i32, i32, i32) {
    %c0_i32 = arith.constant 0 : i32
    %c0_i32_0 = arith.constant 0 : i32
    %c0_i32_1 = arith.constant 0 : i32
    return %arg0, %c0_i32, %c0_i32_0 : i32, i32, i32
  }
  func.func @transform_6(%arg0: i32) -> (i32, i32) {
    %c0_i32 = arith.constant 0 : i32
    %c0_i32_0 = arith.constant 0 : i32
    %c0_i32_1 = arith.constant 0 : i32
    return %c0_i32, %c0_i32_0 : i32, i32
  }
  func.func @transform_7(%arg0: i32) -> (i32, i32) {
    %c0_i32 = arith.constant 0 : i32
    %c0_i32_0 = arith.constant 0 : i32
    %c0_i32_1 = arith.constant 0 : i32
    return %c0_i32, %c0_i32_0 : i32, i32
  }
  func.func @transform_8(%arg0: i32) -> (i32, i32) {
    %c0_i32 = arith.constant 0 : i32
    %c0_i32_0 = arith.constant 0 : i32
    %c0_i32_1 = arith.constant 0 : i32
    return %c0_i32, %c0_i32_0 : i32, i32
  }
  func.func @transform_9(%arg0: i32) -> (i32, i32, i32) {
    %c0_i32 = arith.constant 0 : i32
    %c0_i32_0 = arith.constant 0 : i32
    %c0_i32_1 = arith.constant 0 : i32
    return %arg0, %c0_i32, %c0_i32_0 : i32, i32, i32
  }
  func.func @transform_10(%arg0: i32) -> (i32, i32, i32) {
    %c0_i32 = arith.constant 0 : i32
    %c0_i32_0 = arith.constant 0 : i32
    %c0_i32_1 = arith.constant 0 : i32
    %c0_i32_2 = arith.constant 0 : i32
    return %c0_i32, %c0_i32_0, %c0_i32_1 : i32, i32, i32
  }
  func.func @transform_11(%arg0: i32) -> (i32, i32, i32) {
    %c0_i32 = arith.constant 0 : i32
    %c0_i32_0 = arith.constant 0 : i32
    %c0_i32_1 = arith.constant 0 : i32
    %c0_i32_2 = arith.constant 0 : i32
    return %c0_i32, %c0_i32_0, %c0_i32_1 : i32, i32, i32
  }
}

</mosaic_0001>

<bundles_post_ra>
// kernel: _run_kernel.1
= control target key start
LH: loop header
LB: loop body
LE: loop exit
PB: predicated region body
PF: predicated region fallthrough
CT: control target
= control target key end

     0   :  { %s2929_s0 = inlined_call_operand.<no memory space> [shape: s32[1], index: 0, kind: input, shape index: {}]   ;;  %s2930_s1 = inlined_call_operand.vmem [shape: f32[10], index: 1, kind: input, shape index: {}]   ;;  %s2931_s2 = inlined_call_operand.<no memory space> [shape: f32[1], index: 2, kind: input, shape index: {}]   ;;  %s2932_s3 = inlined_call_operand.vmem [shape: f32[8,16,128], index: 3, kind: input, shape index: {}, may-alias: {3,10}]   ;;  %s2933_s4 = inlined_call_operand.vmem [shape: f32[8,1,1], index: 4, kind: input, shape index: {}, may-alias: {4,11}]   ;;  %s2934_s5 = inlined_call_operand.vmem [shape: f32[10,16,128], index: 5, kind: input, shape index: {}]   ;;  %s2935_s6 = inlined_call_operand.vmem [shape: f32[128,64], index: 6, kind: input, shape index: {}]   ;;  %s2936_s7 = inlined_call_operand.vmem [shape: f32[1,64], index: 7, kind: input, shape index: {}]   ;;  %s2937_s8 = inlined_call_operand.vmem [shape: f32[1,64], index: 8, kind: input, shape index: {}]   ;;  %s2938_s9 = inlined_call_operand.hbm [shape: f32[10,16,128], index: 9, kind: output, shape index: {0}]   ;;  %s2939_s10 = inlined_call_operand.vmem [shape: f32[8,16,128], index: 10, kind: output, shape index: {1}, may-alias: {3,10}]   ;;  %s2940_s11 = inlined_call_operand.vmem [shape: f32[8,1,1], index: 11, kind: output, shape index: {2}, may-alias: {4,11}]  }
   0x1   :  { %2945 = sst [smem:[#allocation13_spill]] %s2930_s1 }
   0x2   :  { %2946 = sst [smem:[#allocation14_spill]] %s2934_s5 }
   0x3   :  { %17 = sst [smem:[#allocation2]] %s2929_s0 }
   0x4   :  { %18 = sst [smem:[#allocation3]] %s2931_s2 }
   0x5   :  { %19 = vsyncpa [#allocation6], 0 }
   0x6   :  { %20 = vsyncpa [#allocation5], 0 }
   0x7   :  { %22 = vsyncpa [#allocation5 + $0x1], 0  ;;  %s1860_s21 = smov 0   ;;  %s1862_s22 = smov 0  }
   0x8   :  { %s1864_s23 = smov 0   ;;  %s1866_s24 = smov 0  }
   0x9 LB: > { %2947 = sst [smem:[#allocation10_spill]] %s1783_s23  ;;  %s1881_s0 = sadd.s32 4294967295, %s1787_s24   ;;  %s1787_s24 = sphi %s1866_s24, %s2977_s24   ;;  %s1783_s23 = sphi %s1864_s23, %s2979_s23   ;;  %s1779_s22 = sphi %s1862_s22, %s2981_s22   ;;  %s1775_s21 = sphi %s1860_s21, %s2980_s21  }
   0xa   : > { %s1473_s2 = sadd.s32 4294967294, %s1787_s24   ;;  %s1885_s25 = sadd.s32 1, %s1787_s24  }
   0xb   : > { %2948 = sst [smem:[#allocation11_spill]] %s1885_s25  ;;  %s229_s26 = sadd.s32 1, %s1783_s23 }
   0xc   : > { %s226_s27 = ssub.s32 %s1787_s24, %s1885_s25  ;;  %p239_p0 = scmp.ne.s32.totalorder %s1783_s23, %s1779_s22 }
   0xd   : > { %p227_p1 = scmp.eq.s32.totalorder %s226_s27, 0  ;;  %p240_p2 = scmp.eq.s32.totalorder %s1881_s0, 9 }
   0xe   : > { %p245_p3 = scmp.ne.s32.totalorder %s1779_s22, %s1775_s21  ;;  %p246_p4 = scmp.eq.s32.totalorder %s1473_s2, 9 }
   0xf   : > { %s1896_s28 = scalar_select %p227_p1, %s1783_s23, %s229_s26  }
  0x10   : > { %p1898_p5 = por %p240_p2, %p239_p0  ;;  %p1902_p6 = por %p246_p4, %p245_p3 }
  0x11   : > { %2949 = sst [smem:[#allocation12_spill]] %s1896_s28  ;;  %p1474_p7 = scmp.ge.s32.totalorder %s1787_s24, 1 }
  0x12   : > { %p295_p8 = scmp.lt.s32.totalorder %s1787_s24, 11  ;;  %p1475_p9 = scmp.ne.s32.totalorder %s1881_s0, 0 }
  0x13   : > { %p1561_p10 = scmp.eq.s32.totalorder %s1881_s0, 0  ;;  %s2952_s1 = sld [smem:[#allocation13_spill]] }
  0x14   : > { %p296_p11 = pnand %p1474_p7, %p295_p8  ;;  %s1789_s15 = smov [#allocation4]  }
  0x16   : > { %p1553_p12 = pneg %p296_p11  ;;  %349 = sbr.rel (%p296_p11) target bundleno = 669 (0x29d), region = 56 }
  0x18   : > { %p1554_p13 = pnand %p1561_p10, %p1553_p12 }
  0x19   : > { %s310_s14 = sshll.u32 %s2952_s1, 4  ;;  %s311_s14 = int_to_ptr.vmem [resolvable:$true] %s310_s14 }
  0x1a   : > { %1556 = dma.vmem_to_smem (!%p1554_p13), %s311_s14, 16, %s1789_s15, [#allocation6]  }
  0x1b   : > { %1766 = dma.done.wait (%p1561_p10), [#allocation6], 16  }
  0x1c   : > { %1768 = vsyncadd (%p1561_p10), [#allocation6], 4294967280 }
  0x1d   : > { %356 = sfence }
  0x1e   : > { %s2942_s16 = sand.u32 1, %s1779_s22   ;;  %p391_p0 = scmp.lt.s32.totalorder %s1881_s0, 9 }
  0x1f   : > { %s1479_s17 = sshll.u32 %s2942_s16, 4  ;;  %s1918_s18 = sld [smem:[#allocation4 + %s1881_s0]] }
  0x20   : > { %s1920_s19 = sld [smem:[#allocation3]]  ;;  %s1931_s25 = scalar_lea.vmem [#allocation7], %s1479_s17 }
  0x21   : > { %s392_s20 = scalar_select %p391_p0, %s1881_s0, 9 }
  0x22   : > { %s398_s2 = sld [smem:[#allocation2]] }
  0x23   : > { %s1517_s26 = sshll.u32 %s392_s20, 4  ;;  %s2953_s5 = sld [smem:[#allocation14_spill]] }
  0x28   : > { %s399_s14 = sadd.s32 %s1881_s0, %s398_s2 }
  0x29   : > { %s1926_s13 = scalar_lea.vmem %s2953_s5, %s1517_s26  ;;  %p400_p1 = scmp.lt.s32.totalorder %s399_s14, 0 }
  0x2a   : > { %s401_s15 = ssub.s32 0, %s399_s14 }
  0x2b   : > { %s1482_s1 = smin.u32 %s401_s15, %s399_s14 }
  0x2c   : > { %s403_s28 = sand.u32 7, %s1482_s1  }
  0x2d   : > { %s404_s23 = ssub.s32 0, %s403_s28  ;;  %415 = sbr.rel (%p1475_p9) target bundleno = 158 (0x9e), region = 64 }
  0x2e   : > { %s2983_s23 = smov (!%p400_p1, %s404_s23), %s403_s28 }
  0x2f   : > { %p1484_p2 = scmp.lt.s32.totalorder %s2983_s23, 0  ;;  %s410_s16 = sadd.s32 8, %s2983_s23 }
  0x31   : > { %s2985_s16 = smov (!%p1484_p2, %s410_s16), %s2983_s23 }
  0x32   : > { %v416_v0 = vld [vmem:[%s2932_s3] sm:$0xff]  ;;  %v417_v1 = vld [vmem:[%s2932_s3 + $0x8] sm:$0xff]  ;;  %v418_v2 = vld [vmem:[%s2932_s3 + $0x10] sm:$0xff]  ;;  %vm456_vm0 = vcmask 0  }
  0x33   : > { %432 = vst [vmem:[%s2939_s10] sm:$0xff] %v416_v0  ;;  %v448_v16 = vld [vmem:[%s2933_s4] sm:$0x1]  ;;  %v449_v17 = vld [vmem:[%s2933_s4 + $0x1] sm:$0x1]  ;;  %v450_v18 = vld [vmem:[%s2933_s4 + $0x2] sm:$0x1] }
  0x34   : > { %457 = vst.msk [vmem:[%s2940_s11] sm:$0x1] %vm456_vm0, %v448_v16 }
  0x3a   : > { %v419_v3 = vld [vmem:[%s2932_s3 + $0x18] sm:$0xff] }
  0x3b   : > { %433 = vst [vmem:[%s2939_s10 + $0x8] sm:$0xff] %v417_v1  ;;  %v451_v19 = vld [vmem:[%s2933_s4 + $0x3] sm:$0x1] }
  0x3c   : > { %458 = vst.msk [vmem:[%s2940_s11 + $0x1] sm:$0x1] %vm456_vm0, %v449_v17 }
  0x42   : > { %v420_v4 = vld [vmem:[%s2932_s3 + $0x20] sm:$0xff] }
  0x43   : > { %434 = vst [vmem:[%s2939_s10 + $0x10] sm:$0xff] %v418_v2  ;;  %v452_v20 = vld [vmem:[%s2933_s4 + $0x4] sm:$0x1] }
  0x44   : > { %459 = vst.msk [vmem:[%s2940_s11 + $0x2] sm:$0x1] %vm456_vm0, %v450_v18 }
  0x4a   : > { %v421_v5 = vld [vmem:[%s2932_s3 + $0x28] sm:$0xff] }
  0x4b   : > { %435 = vst [vmem:[%s2939_s10 + $0x18] sm:$0xff] %v419_v3  ;;  %v453_v21 = vld [vmem:[%s2933_s4 + $0x5] sm:$0x1] }
  0x4c   : > { %460 = vst.msk [vmem:[%s2940_s11 + $0x3] sm:$0x1] %vm456_vm0, %v451_v19 }
  0x52   : > { %v422_v6 = vld [vmem:[%s2932_s3 + $0x30] sm:$0xff] }
  0x53   : > { %436 = vst [vmem:[%s2939_s10 + $0x20] sm:$0xff] %v420_v4  ;;  %v454_v22 = vld [vmem:[%s2933_s4 + $0x6] sm:$0x1] }
  0x54   : > { %461 = vst.msk [vmem:[%s2940_s11 + $0x4] sm:$0x1] %vm456_vm0, %v452_v20 }
  0x5a   : > { %v423_v7 = vld [vmem:[%s2932_s3 + $0x38] sm:$0xff] }
  0x5b   : > { %437 = vst [vmem:[%s2939_s10 + $0x28] sm:$0xff] %v421_v5  ;;  %v455_v23 = vld [vmem:[%s2933_s4 + $0x7] sm:$0x1] }
  0x5c   : > { %462 = vst.msk [vmem:[%s2940_s11 + $0x5] sm:$0x1] %vm456_vm0, %v453_v21 }
  0x5d   : > { %463 = vst.msk [vmem:[%s2940_s11 + $0x6] sm:$0x1] %vm456_vm0, %v454_v22 }
  0x5e   : > { %464 = vst.msk [vmem:[%s2940_s11 + $0x7] sm:$0x1] %vm456_vm0, %v455_v23 }
  0x62   : > { %v424_v8 = vld [vmem:[%s2932_s3 + $0x40] sm:$0xff] }
  0x63   : > { %438 = vst [vmem:[%s2939_s10 + $0x30] sm:$0xff] %v422_v6 }
  0x6a   : > { %v425_v9 = vld [vmem:[%s2932_s3 + $0x48] sm:$0xff] }
  0x6b   : > { %439 = vst [vmem:[%s2939_s10 + $0x38] sm:$0xff] %v423_v7 }
  0x72   : > { %v426_v10 = vld [vmem:[%s2932_s3 + $0x50] sm:$0xff] }
  0x73   : > { %440 = vst [vmem:[%s2939_s10 + $0x40] sm:$0xff] %v424_v8 }
  0x7a   : > { %v427_v11 = vld [vmem:[%s2932_s3 + $0x58] sm:$0xff] }
  0x7b   : > { %441 = vst [vmem:[%s2939_s10 + $0x48] sm:$0xff] %v425_v9 }
  0x82   : > { %v428_v12 = vld [vmem:[%s2932_s3 + $0x60] sm:$0xff] }
  0x83   : > { %442 = vst [vmem:[%s2939_s10 + $0x50] sm:$0xff] %v426_v10 }
  0x8a   : > { %v429_v13 = vld [vmem:[%s2932_s3 + $0x68] sm:$0xff] }
  0x8b   : > { %443 = vst [vmem:[%s2939_s10 + $0x58] sm:$0xff] %v427_v11 }
  0x92   : > { %v430_v14 = vld [vmem:[%s2932_s3 + $0x70] sm:$0xff] }
  0x93   : > { %444 = vst [vmem:[%s2939_s10 + $0x60] sm:$0xff] %v428_v12 }
  0x9a   : > { %v431_v15 = vld [vmem:[%s2932_s3 + $0x78] sm:$0xff] }
  0x9b   : > { %445 = vst [vmem:[%s2939_s10 + $0x68] sm:$0xff] %v429_v13 }
  0x9c   : > { %446 = vst [vmem:[%s2939_s10 + $0x70] sm:$0xff] %v430_v14 }
  0x9d   : > { %447 = vst [vmem:[%s2939_s10 + $0x78] sm:$0xff] %v431_v15 }
  0x9e PF: > { %v633_v24 = vld [vmem:[%s2935_s6 + $0x70] sm:$0xff]  ;;  %v634_v25 = vld [vmem:[%s2935_s6 + $0x78] sm:$0xff]  ;;  %v631_v26 = vld [vmem:[%s2935_s6 + $0x60] sm:$0xff]  ;;  %s1486_s28 = sshll.u32 %s2985_s16, 4  ;;  %v2134_v44 = vstv %s2985_s16  ;;  %vm497_vm1 = vcmask 0   ;;  %v1790_v49 = vmov 0  }
  0x9f   : > { %v642_v27 = vpack.c.bf16 %v634_v25, %v633_v24  ;;  %v632_v28 = vld [vmem:[%s2935_s6 + $0x68] sm:$0xff]  ;;  %s2103_s15 = scalar_lea.vmem %s2939_s10, %s1486_s28  ;;  %v629_v30 = vld [vmem:[%s2935_s6 + $0x50] sm:$0xff]  ;;  %v630_v31 = vld [vmem:[%s2935_s6 + $0x58] sm:$0xff]  ;;  %vm472_vm2 = vcmp.eq.s32.totalorder %v2134_v44, 0  ;;  %v2147_v48 = vstv %s1918_s18  ;;  %1601 = vset.pattern.permute.xlu1 %v1790_v49  ;;  %1602 = vset.pattern.permute.xlu0 %v1790_v49  ;;  %vm473_vm3 = vcmp.eq.s32.totalorder %v2134_v44, 1  ;;  %s1487_s23 = sadd.f32 -1.0, %s1918_s18 }
  0xa0   : > { %v641_v29 = vpack.c.bf16 %v632_v28, %v631_v26  ;;  %v465_v32 = vld [vmem:[%s1926_s13] sm:$0xff]  ;;  %v466_v33 = vld [vmem:[%s1926_s13 + $0x8] sm:$0xff]  ;;  %v640_v34 = vpack.c.bf16 %v630_v31, %v629_v30  ;;  %v625_v38 = vld [vmem:[%s2935_s6 + $0x30] sm:$0xff]  ;;  %vm475_vm4 = vcmp.eq.s32.totalorder %v2134_v44, 3  ;;  %1603 = vset.pattern.permute.xlu2 %v1790_v49  ;;  %vm474_vm5 = vcmp.eq.s32.totalorder %v2134_v44, 2  ;;  %s1518_s27 = sshll.u32 %s1881_s0, 4 }
  0xa1   : > { %647 = vmatpush.bf16.msra.mxu0 %v642_v27  ;;  %1519 = vmatpush.bf16.msra.mxu1 %v642_v27  ;;  %469 = vst [vmem:[%s2103_s15] sm:$0xff] %v465_v32  ;;  %v627_v35 = vld [vmem:[%s2935_s6 + $0x40] sm:$0xff]  ;;  %v628_v36 = vld [vmem:[%s2935_s6 + $0x48] sm:$0xff]  ;;  %v626_v39 = vld [vmem:[%s2935_s6 + $0x38] sm:$0xff]  ;;  %v1791_v26 = vmov 0.0   ;;  %vm732_vm10 = vcmask 523264   ;;  %vm478_vm11 = vcmp.eq.s32.totalorder %v2134_v44, 6  ;;  %s1381_s12 = scalar_lea.hbm %s2938_s9, %s1518_s27 }
  0xa2   : > { %1521 = vmatpush.bf16.msra.mxu3 %v642_v27  ;;  %1520 = vmatpush.bf16.msra.mxu2 %v642_v27  ;;  %470 = vst [vmem:[%s2103_s15 + $0x8] sm:$0xff] %v466_v33  ;;  %v639_v37 = vpack.c.bf16 %v628_v36, %v627_v35  ;;  %v638_v40 = vpack.c.bf16 %v626_v39, %v625_v38  ;;  %v623_v41 = vld [vmem:[%s2935_s6 + $0x20] sm:$0xff]  ;;  %v624_v42 = vld [vmem:[%s2935_s6 + $0x28] sm:$0xff]  ;;  %v621_v45 = vld [vmem:[%s2935_s6 + $0x10] sm:$0xff]  ;;  %vm476_vm12 = vcmp.eq.s32.totalorder %v2134_v44, 4  ;;  %s1382_s0 = sshll.u32 %s1931_s25, 4  ;;  %s1383_s0 = int_to_ptr.vmem [resolvable:$true] %s1382_s0 }
  0xa3   : > { %v637_v43 = vpack.c.bf16 %v624_v42, %v623_v41  ;;  %v622_v46 = vld [vmem:[%s2935_s6 + $0x18] sm:$0xff]  ;;  %v480_v47 = vld [vmem:[%s2940_s11] sm:$0x1]  ;;  %v481_v51 = vld [vmem:[%s2940_s11 + $0x1] sm:$0x1]  ;;  %v2230_v18 = vstv %s1487_s23  ;;  %s1384_s28 = sshll.u32 %s1381_s12, 4  ;;  %s1385_s28 = int_to_ptr.hbm [resolvable:$true] %s1384_s28 }
  0xa4   : > { %v489_v50 = vsel %vm472_vm2, %v2147_v48, %v480_v47  ;;  %v483_v52 = vld [vmem:[%s2940_s11 + $0x3] sm:$0x1]  ;;  %v490_v53 = vsel %vm473_vm3, %v2147_v48, %v481_v51  ;;  %v636_v54 = vpack.c.bf16 %v622_v46, %v621_v45  ;;  %v482_v56 = vld [vmem:[%s2940_s11 + $0x2] sm:$0x1]  ;;  %v620_v58 = vld [vmem:[%s2935_s6 + $0x8] sm:$0xff]  ;;  %s2976_s23 = sand.u32 1, %s1779_s22  }
  0xa5   : > { %648 = vmatpush.bf16.msra.mxu0 %v641_v29  ;;  %1522 = vmatpush.bf16.msra.mxu1 %v641_v29  ;;  %498 = vst.msk [vmem:[%s2940_s11] sm:$0x1] %vm497_vm1, %v489_v50  ;;  %v492_v55 = vsel %vm475_vm4, %v2147_v48, %v483_v52  ;;  %v619_v57 = vld [vmem:[%s2935_s6] sm:$0xff]  ;;  %v491_v59 = vsel %vm474_vm5, %v2147_v48, %v482_v56  ;;  %s1370_s13 = scalar_lea.sflag [#allocation5], %s2976_s23  ;;  %s1735_s17 = sshra.s32 %s1385_s28, 4  ;;  %s1736_s17 = int_to_ptr.hbm [resolvable:$true] %s1735_s17 }
  0xa6   : > { %1524 = vmatpush.bf16.msra.mxu3 %v641_v29  ;;  %1523 = vmatpush.bf16.msra.mxu2 %v641_v29  ;;  %499 = vst.msk [vmem:[%s2940_s11 + $0x1] sm:$0x1] %vm497_vm1, %v490_v53  ;;  %v635_v62 = vpack.c.bf16 %v620_v58, %v619_v57  ;;  %v2280_v58 = vld [vmem:[%s2936_s7] ss:$0 sm:$0xff]  ;;  %s1737_s16 = scalar_lea.hbm %s1736_s17, 16  ;;  %s1741_s14 = scalar_lea.hbm %s2938_s9, 160 }
  0xa7   : > { %501 = vst.msk [vmem:[%s2940_s11 + $0x3] sm:$0x1] %vm497_vm1, %v492_v55  ;;  %p1738_p3 = scmp.ne.s32.totalorder %s1736_s17, %s1737_s16  ;;  %p1742_p8 = scmp.lt.s32.totalorder %s1736_s17, %s2938_s9 }
  0xa8   : > { %500 = vst.msk [vmem:[%s2940_s11 + $0x2] sm:$0x1] %vm497_vm1, %v491_v59  ;;  %p1743_p9 = scmp.lt.s32.totalorder %s1741_s14, %s1737_s16 }
  0xa9   : > { %649 = vmatpush.bf16.msra.mxu0 %v640_v34  ;;  %1525 = vmatpush.bf16.msra.mxu1 %v640_v34  ;;  %v506_v60 = vld [vmem:[%s2939_s10] sm:$0xff]  ;;  %v507_v61 = vld [vmem:[%s2939_s10 + $0x8] sm:$0xff]  ;;  %v516_v30 = vld [vmem:[%s2939_s10 + $0x50] sm:$0xff]  ;;  %p1739_p4 = pnand %p1738_p3, %p1898_p5 }
  0xaa   : > { %1527 = vmatpush.bf16.msra.mxu3 %v640_v34  ;;  %1526 = vmatpush.bf16.msra.mxu2 %v640_v34  ;;  %v510_v63 = vld [vmem:[%s2939_s10 + $0x20] sm:$0xff]  ;;  %v511_v0 = vld [vmem:[%s2939_s10 + $0x28] sm:$0xff]  ;;  %v611_v6 = vpack.c.bf16 %v507_v61, %v506_v60  ;;  %v508_v31 = vld [vmem:[%s2939_s10 + $0x10] sm:$0xff]  ;;  %p1744_p10 = por %p1743_p9, %p1742_p8 }
  0xab   : > { %v518_v1 = vld [vmem:[%s2939_s10 + $0x60] sm:$0xff]  ;;  %v519_v2 = vld [vmem:[%s2939_s10 + $0x68] sm:$0xff]  ;;  %v613_v7 = vpack.c.bf16 %v511_v0, %v510_v63  ;;  %v509_v33 = vld [vmem:[%s2939_s10 + $0x18] sm:$0xff]  ;;  %p1740_p7 = pneg %p1739_p4 }
  0xac   : > { %v514_v3 = vld [vmem:[%s2939_s10 + $0x40] sm:$0xff]  ;;  %v515_v4 = vld [vmem:[%s2939_s10 + $0x48] sm:$0xff]  ;;  %v617_v10 = vpack.c.bf16 %v519_v2, %v518_v1  ;;  %v512_v34 = vld [vmem:[%s2939_s10 + $0x30] sm:$0xff]  ;;  %v612_v46 = vpack.c.bf16 %v509_v33, %v508_v31 }
  0xad   : > { %650 = vmatpush.bf16.msra.mxu0 %v639_v37  ;;  %1528 = vmatpush.bf16.msra.mxu1 %v639_v37  ;;  %v522_v5 = vld [vmem:[%s2940_s11] sm:$0x1]  ;;  %v523_v9 = vld [vmem:[%s2940_s11 + $0x1] sm:$0x1]  ;;  %v615_v11 = vpack.c.bf16 %v515_v4, %v514_v3  ;;  %v513_v35 = vld [vmem:[%s2939_s10 + $0x38] sm:$0xff]  ;;  %p1745_p11 = pnand %p1744_p10, %p1740_p7 }
  0xae   : > { %1530 = vmatpush.bf16.msra.mxu3 %v639_v37  ;;  %1529 = vmatpush.bf16.msra.mxu2 %v639_v37  ;;  %v556_v8 = vsub.f32 %v2147_v48, %v522_v5  ;;  %v557_v12 = vsub.f32 %v2147_v48, %v523_v9  ;;  %v525_v13 = vld [vmem:[%s2940_s11 + $0x3] sm:$0x1]  ;;  %vm532_vm6 = vcmp.gt.f32.partialorder %v522_v5, %v2230_v18  ;;  %v517_v37 = vld [vmem:[%s2939_s10 + $0x58] sm:$0xff]  ;;  %v520_v38 = vld [vmem:[%s2939_s10 + $0x70] sm:$0xff] }
  0xaf   : > { %v524_v15 = vld [vmem:[%s2940_s11 + $0x2] sm:$0x1]  ;;  %v559_v17 = vsub.f32 %v2147_v48, %v525_v13  ;;  %vm533_vm7 = vcmp.gt.f32.partialorder %v523_v9, %v2230_v18  ;;  %v2236_v27 = vsel %vm532_vm6, 1.0, %v1791_v26  ;;  %vm535_vm8 = vcmp.gt.f32.partialorder %v525_v13, %v2230_v18  ;;  %v521_v39 = vld [vmem:[%s2939_s10 + $0x78] sm:$0xff]  ;;  %v2287_v63 = vld [vmem:[%s2937_s8] ss:$0 sm:$0xff] }
  0xb0   : > { %v564_v14 = vmul.f32 -0.1, %v556_v8  ;;  %v565_v16 = vmul.f32 -0.1, %v557_v12  ;;  %v558_v22 = vsub.f32 %v2147_v48, %v524_v15  ;;  %v2239_v28 = vsel %vm533_vm7, 1.0, %v1791_v26 }
  0xb1   : > { %651 = vmatpush.bf16.msra.mxu0 %v638_v40  ;;  %1531 = vmatpush.bf16.msra.mxu1 %v638_v40  ;;  %v567_v21 = vmul.f32 -0.1, %v559_v17  ;;  %vm534_vm9 = vcmp.gt.f32.partialorder %v524_v15, %v2230_v18  ;;  %v2270_v41 = vsel %vm535_vm8, 1.0, %v1791_v26  ;;  %v614_v47 = vpack.c.bf16 %v513_v35, %v512_v34 }
  0xb2   : > { %1533 = vmatpush.bf16.msra.mxu3 %v638_v40  ;;  %1532 = vmatpush.bf16.msra.mxu2 %v638_v40  ;;  %v572_v19 = vmul.f32 1.442695, %v564_v14  ;;  %v574_v20 = vmul.f32 1.442695, %v565_v16  ;;  %v566_v24 = vmul.f32 -0.1, %v558_v22  ;;  %v616_v52 = vpack.c.bf16 %v517_v37, %v516_v30 }
  0xb3   : > { %v578_v23 = vmul.f32 1.442695, %v567_v21  ;;  %v2273_v45 = vsel %vm534_vm9, 1.0, %v1791_v26  ;;  %v618_v53 = vpack.c.bf16 %v521_v39, %v520_v38 }
  0xb4   : > { %1606 = vpow2.f32 %v572_v19  ;;  %v576_v25 = vmul.f32 1.442695, %v566_v24 }
  0xb5   : > { %652 = vmatpush.bf16.msra.mxu0 %v637_v43  ;;  %1534 = vmatpush.bf16.msra.mxu1 %v637_v43  ;;  %1608 = vpow2.f32 %v574_v20 }
  0xb6   : > { %1536 = vmatpush.bf16.msra.mxu3 %v637_v43  ;;  %1535 = vmatpush.bf16.msra.mxu2 %v637_v43  ;;  %1610 = vpow2.f32 %v578_v23 }
  0xb7   : > { %1612 = vpow2.f32 %v576_v25 }
  0xb9   : > { %653 = vmatpush.bf16.msra.mxu0 %v636_v54  ;;  %1537 = vmatpush.bf16.msra.mxu1 %v636_v54 }
  0xba   : > { %1539 = vmatpush.bf16.msra.mxu3 %v636_v54  ;;  %1538 = vmatpush.bf16.msra.mxu2 %v636_v54  ;;  %v1607_v29 = vpop.eup %1606 }
  0xbb   : > { %v1609_v32 = vpop.eup %1608  ;;  %v588_v36 = vmul.f32 %v1607_v29, %v2236_v27 }
  0xbc   : > { %v589_v40 = vmul.f32 %v1609_v32, %v2239_v28  ;;  %v1611_v42 = vpop.eup %1610 }
  0xbd   : > { %654 = vmatpush.bf16.msra.mxu0 %v635_v62  ;;  %1540 = vmatpush.bf16.msra.mxu1 %v635_v62  ;;  %v1284_v43 = vperm.slane %v588_v36, 0  ;;  %v1613_v51 = vpop.eup %1612  ;;  %v591_v54 = vmul.f32 %v1611_v42, %v2270_v41 }
  0xbe   : > { %1542 = vmatpush.bf16.msra.mxu3 %v635_v62  ;;  %1541 = vmatpush.bf16.msra.mxu2 %v635_v62  ;;  %v1285_v50 = vperm.slane %v589_v40, 0  ;;  %v590_v55 = vmul.f32 %v1613_v51, %v2273_v45 }
  0xbf   : > { %1293 = vperm.xlu1 %1601, %v1284_v43   ;;  %v1287_v57 = vperm.slane %v591_v54, 0 }
  0xc0   : > { %655 = vmatmul.bf16.vlgmr.msra.gmra.mxu0 %v611_v6  ;;  %665 = vmatmul.bf16.vlgmr.msra.gmra.mxu1 %v613_v7  ;;  %v1286_v56 = vperm.slane %v590_v55, 0 }
  0xc1   : > { %685 = vmatmul.bf16.vlgmr.msra.gmra.mxu3 %v617_v10  ;;  %675 = vmatmul.bf16.vlgmr.msra.gmra.mxu2 %v615_v11 }
  0xc2   : > { %1297 = vperm.xlu0 %1602, %v1285_v50   ;;  %1301 = vperm.xlu2 %1603, %v1286_v56  }
  0xc7   : > { %1305 = vperm.xlu1 %1601, %v1287_v57  }
  0xd0   : > { %660 = vmatmul.bf16.gmra.mxu0 %v612_v46  ;;  %670 = vmatmul.bf16.gmra.mxu1 %v614_v47 }
  0xd1   : > { %680 = vmatmul.bf16.gmra.mxu2 %v616_v52  ;;  %690 = vmatmul.bf16.gmra.mxu3 %v618_v53 }
 0x13d   : > { %v656_v59 = vpop.f32.mrf.mxu0  ;;  %v666_v60 = vpop.f32.mrf.mxu1 }
 0x13e   : > { %v657_v61 = vadd.f32 %v2280_v58, %v656_v59  ;;  %v667_v62 = vadd.f32 %v2280_v58, %v666_v60 }
 0x140   : > { %v696_v0 = vmax.f32 %v657_v61, 0.0  ;;  %v700_v1 = vmax.f32 %v667_v62, 0.0 }
 0x142   : > { %v720_v2 = vmul.f32 %v2287_v63, %v700_v1  ;;  %v716_v3 = vmul.f32 %v2287_v63, %v696_v0 }
 0x144   : > { %v686_v4 = vpop.f32.mrf.mxu3  ;;  %v676_v5 = vpop.f32.mrf.mxu2  ;;  %v745_v6 = vsel %vm732_vm10, %v720_v2, 0.0  ;;  %v733_v7 = vsel %vm732_vm10, %v716_v3, 0.0 }
 0x145   : > { %v687_v8 = vadd.f32 %v2280_v58, %v686_v4  ;;  %v677_v9 = vadd.f32 %v2280_v58, %v676_v5  ;;  %746 = vadd.xlane.f32.xlu2 %v745_v6  ;;  %v658_v10 = vpop.f32.mrf.mxu0  ;;  %734 = vadd.xlane.f32.xlu0 %v733_v7  ;;  %v668_v11 = vpop.f32.mrf.mxu1 }
 0x146   : > { %v659_v14 = vadd.f32 %v2280_v58, %v658_v10  ;;  %v669_v15 = vadd.f32 %v2280_v58, %v668_v11 }
 0x147   : > { %v708_v12 = vmax.f32 %v687_v8, 0.0  ;;  %v704_v13 = vmax.f32 %v677_v9, 0.0 }
 0x148   : > { %v697_v21 = vmax.f32 %v659_v14, 0.0  ;;  %v701_v22 = vmax.f32 %v669_v15, 0.0 }
 0x149   : > { %v724_v16 = vmul.f32 %v2287_v63, %v704_v13  ;;  %v728_v17 = vmul.f32 %v2287_v63, %v708_v12 }
 0x14a   : > { %v721_v33 = vmul.f32 %v2287_v63, %v701_v22  ;;  %v717_v34 = vmul.f32 %v2287_v63, %v697_v21 }
 0x14b   : > { %v757_v19 = vsel %vm732_vm10, %v724_v16, 0.0  ;;  %v769_v20 = vsel %vm732_vm10, %v728_v17, 0.0 }
 0x14c   : > { %v688_v23 = vpop.f32.mrf.mxu3  ;;  %v678_v24 = vpop.f32.mrf.mxu2  ;;  %v748_v42 = vsel %vm732_vm10, %v721_v33, 0.0  ;;  %v736_v43 = vsel %vm732_vm10, %v717_v34, 0.0 }
 0x14d   : > { %v689_v25 = vadd.f32 %v2280_v58, %v688_v23  ;;  %758 = vadd.xlane.f32.xlu2 %v757_v19  ;;  %770 = vadd.xlane.f32.xlu0 %v769_v20  ;;  %v661_v29 = vpop.f32.mrf.mxu0  ;;  %v679_v32 = vadd.f32 %v2280_v58, %v678_v24  ;;  %v671_v46 = vpop.f32.mrf.mxu1 }
 0x14e   : > { %v662_v30 = vadd.f32 %v2280_v58, %v661_v29  ;;  %v672_v52 = vadd.f32 %v2280_v58, %v671_v46  ;;  %v2335_v24 = vpop.permute.xlu0 %1297  ;;  %v2339_v29 = vpop.permute.xlu1 %1293 }
 0x14f   : > { %v709_v31 = vmax.f32 %v689_v25, 0.0  ;;  %v705_v38 = vmax.f32 %v679_v32, 0.0  ;;  %v2337_v25 = vpop.permute.xlu2 %1301 }
 0x150   : > { %v698_v36 = vmax.f32 %v662_v30, 0.0  ;;  %v702_v59 = vmax.f32 %v672_v52, 0.0  ;;  %v2346_v30 = vstv %s1920_s19 }
 0x151   : > { %v729_v35 = vmul.f32 %v2287_v63, %v709_v31  ;;  %v725_v54 = vmul.f32 %v2287_v63, %v705_v38 }
 0x152   : > { %v718_v51 = vmul.f32 %v2287_v63, %v698_v36  ;;  %v722_v6 = vmul.f32 %v2287_v63, %v702_v59 }
 0x153   : > { %v772_v37 = vsel %vm732_vm10, %v729_v35, 0.0  ;;  %v760_v0 = vsel %vm732_vm10, %v725_v54, 0.0 }
 0x154   : > { %773 = vadd.xlane.f32.xlu1 %v772_v37  ;;  %v681_v39 = vpop.f32.mrf.mxu2  ;;  %v691_v40 = vpop.f32.mrf.mxu3  ;;  %v739_v56 = vsel %vm732_vm10, %v718_v51, 0.0  ;;  %v751_v12 = vsel %vm732_vm10, %v722_v6, 0.0  ;;  %v484_v37 = vld [vmem:[%s2940_s11 + $0x4] sm:$0x1] }
 0x155   : > { %v682_v47 = vadd.f32 %v2280_v58, %v681_v39  ;;  %v692_v50 = vadd.f32 %v2280_v58, %v691_v40  ;;  %749 = vadd.xlane.f32.xlu2 %v748_v42  ;;  %737 = vadd.xlane.f32.xlu0 %v736_v43  ;;  %v663_v60 = vpop.f32.mrf.mxu0  ;;  %v673_v14 = vpop.f32.mrf.mxu1  ;;  %v493_v38 = vsel %vm476_vm12, %v2147_v48, %v484_v37 }
 0x156   : > { %v664_v3 = vadd.f32 %v2280_v58, %v663_v60  ;;  %v674_v17 = vadd.f32 %v2280_v58, %v673_v14  ;;  %502 = vst.msk [vmem:[%s2940_s11 + $0x4] sm:$0x1] %vm497_vm1, %v493_v38  ;;  %v2364_v39 = vpop.permute.xlu1 %1305 }
 0x157   : > { %v710_v53 = vmax.f32 %v692_v50, 0.0  ;;  %v706_v55 = vmax.f32 %v682_v47, 0.0 }
 0x158   : > { %v699_v8 = vmax.f32 %v664_v3, 0.0  ;;  %v703_v21 = vmax.f32 %v674_v17, 0.0 }
 0x159   : > { %v730_v57 = vmul.f32 %v2287_v63, %v710_v53  ;;  %v726_v4 = vmul.f32 %v2287_v63, %v706_v55 }
 0x15a   : > { %v719_v15 = vmul.f32 %v2287_v63, %v699_v8  ;;  %v723_v22 = vmul.f32 %v2287_v63, %v703_v21 }
 0x15b   : > { %v775_v61 = vsel %vm732_vm10, %v730_v57, 0.0  ;;  %v763_v9 = vsel %vm732_vm10, %v726_v4, 0.0  ;;  %v1112_v4 = vperm.slane %v2236_v27, 0 }
 0x15c   : > { %740 = vadd.xlane.f32.xlu1 %v739_v56  ;;  %v683_v62 = vpop.f32.mrf.mxu2  ;;  %v693_v1 = vpop.f32.mrf.mxu3  ;;  %v742_v19 = vsel %vm732_vm10, %v719_v15, 0.0  ;;  %v754_v23 = vsel %vm732_vm10, %v723_v22, 0.0 }
 0x15d   : > { %v684_v2 = vadd.f32 %v2280_v58, %v683_v62  ;;  %776 = vadd.xlane.f32.xlu2 %v775_v61  ;;  %761 = vadd.xlane.f32.xlu0 %v760_v0  ;;  %v694_v5 = vadd.f32 %v2280_v58, %v693_v1  ;;  %v486_v58 = vld [vmem:[%s2940_s11 + $0x6] sm:$0x1] }
 0x15e   : > { %v495_v31 = vsel %vm478_vm11, %v2147_v48, %v486_v58 }
 0x15f   : > { %v707_v7 = vmax.f32 %v684_v2, 0.0  ;;  %v711_v11 = vmax.f32 %v694_v5, 0.0  ;;  %504 = vst.msk [vmem:[%s2940_s11 + $0x6] sm:$0x1] %vm497_vm1, %v495_v31 }
 0x161   : > { %v727_v10 = vmul.f32 %v2287_v63, %v707_v7  ;;  %v731_v16 = vmul.f32 %v2287_v63, %v711_v11  ;;  %v1114_v7 = vperm.slane %v2273_v45, 0 }
 0x163   : > { %v766_v13 = vsel %vm732_vm10, %v727_v10, 0.0  ;;  %v778_v20 = vsel %vm732_vm10, %v731_v16, 0.0 }
 0x164   : > { %764 = vadd.xlane.f32.xlu1 %v763_v9 }
 0x165   : > { %767 = vadd.xlane.f32.xlu2 %v766_v13  ;;  %752 = vadd.xlane.f32.xlu0 %v751_v12  ;;  %v2400_v12 = vld [vmem:[%s2940_s11 + $0x4] sm:$0x1] }
 0x166   : > { %v2376_v55 = vld [vmem:[%s2940_s11 + $0x6] sm:$0x1]  ;;  %vm536_vm0 = vcmp.gt.f32.partialorder %v2400_v12, %v2230_v18 }
 0x167   : > { %vm538_vm13 = vcmp.gt.f32.partialorder %v2376_v55, %v2230_v18 }
 0x168   : > { %v2391_v8 = vsel %vm538_vm13, 1.0, %v1791_v26 }
 0x16c   : > { %743 = vadd.xlane.f32.xlu1 %v742_v19 }
 0x16d   : > { %779 = vadd.xlane.f32.xlu0 %v778_v20 }
 0x174   : > { %755 = vadd.xlane.f32.xlu1 %v754_v23 }
 0x1b8   : > { %v747_v63 = vpop.xlane.xlu2 %746  ;;  %v735_v32 = vpop.xlane.xlu0 %734 }
 0x1b9   : > { %v786_v33 = vadd.f32 %v2346_v30, %v747_v63  ;;  %v782_v34 = vadd.f32 %v2346_v30, %v735_v32 }
 0x1bb   : > { %v1500_v35 = vmul.f32 -1.442695, %v786_v33  ;;  %v1496_v36 = vmul.f32 -1.442695, %v782_v34 }
 0x1bd   : > { %1614 = vpow2.f32 %v1500_v35 }
 0x1be   : > { %1616 = vpow2.f32 %v1496_v36 }
 0x1c0   : > { %v759_v40 = vpop.xlane.xlu2 %758  ;;  %v771_v42 = vpop.xlane.xlu0 %770 }
 0x1c1   : > { %v790_v43 = vadd.f32 %v2346_v30, %v759_v40  ;;  %v794_v46 = vadd.f32 %v2346_v30, %v771_v42 }
 0x1c3   : > { %v1615_v47 = vpop.eup %1614  ;;  %v1504_v50 = vmul.f32 -1.442695, %v790_v43  ;;  %v1508_v53 = vmul.f32 -1.442695, %v794_v46 }
 0x1c4   : > { %v1617_v51 = vpop.eup %1616  ;;  %v2368_v52 = vadd.f32 1.0, %v1615_v47 }
 0x1c5   : > { %v2370_v54 = vadd.f32 1.0, %v1617_v51  ;;  %1618 = vpow2.f32 %v1504_v50  ;;  %v1118_v51 = vperm.slane %v2391_v8, 0 }
 0x1c6   : > { %1620 = vrcp.f32 %v2368_v52  ;;  %vm927_vm14 = vweird.f32 %v2368_v52  ;;  %v931_v11 = vand.u32 2147483647, %v2368_v52  ;;  %v933_v15 = vand.u32 2147483648, %v2368_v52 }
 0x1c7   : > { %1622 = vrcp.f32 %v2370_v54  ;;  %v774_v56 = vpop.xlane.xlu1 %773  ;;  %vm867_vm15 = vweird.f32 %v2370_v54  ;;  %v871_v19 = vand.u32 2147483647, %v2370_v54  ;;  %v873_v31 = vand.u32 2147483648, %v2370_v54 }
 0x1c8   : > { %1624 = vpow2.f32 %v1508_v53  ;;  %v795_v57 = vadd.f32 %v2346_v30, %v774_v56  ;;  %v750_v59 = vpop.xlane.xlu2 %749  ;;  %v738_v60 = vpop.xlane.xlu0 %737  ;;  %vm2417_vm3 = vcmp.eq.f32.partialorder %v931_v11, 8.507059e+37  ;;  %v934_v43 = vor.u32 1.1754944e-38, %v933_v15 }
 0x1c9   : > { %v787_v61 = vadd.f32 %v2346_v30, %v750_v59  ;;  %v783_v62 = vadd.f32 %v2346_v30, %v738_v60  ;;  %vm2421_vm4 = vcmp.eq.f32.partialorder %v871_v19, 8.507059e+37  ;;  %v874_v50 = vor.u32 1.1754944e-38, %v873_v31 }
 0x1ca   : > { %v1509_v0 = vmul.f32 -1.442695, %v795_v57  ;;  %v2433_v53 = vsel %vm536_vm0, 1.0, %v1791_v26 }
 0x1cb   : > { %v1619_v1 = vpop.eup %1618  ;;  %v1501_v2 = vmul.f32 -1.442695, %v787_v61  ;;  %v1497_v3 = vmul.f32 -1.442695, %v783_v62 }
 0x1cc   : > { %v2385_v5 = vpop.eup %1620  ;;  %v2387_v6 = vadd.f32 1.0, %v1619_v1  ;;  %1626 = vpow2.f32 %v1509_v0 }
 0x1cd   : > { %v1623_v9 = vpop.eup %1622  ;;  %v923_v10 = vmul.f32 %v2385_v5, %v2368_v52  ;;  %1628 = vpow2.f32 %v1501_v2  ;;  %vm928_vm5 = vweird.f32 %v2385_v5 }
 0x1ce   : > { %v1625_v13 = vpop.eup %1624  ;;  %v863_v14 = vmul.f32 %v1623_v9, %v2370_v54  ;;  %1630 = vrcp.f32 %v2387_v6  ;;  %vm868_vm2 = vweird.f32 %v1623_v9  ;;  %v991_v60 = vand.u32 2147483647, %v2387_v6  ;;  %vm2448_vm7 = vmor %vm927_vm14, %vm928_vm5 }
 0x1cf   : > { %v2406_v16 = vadd.f32 1.0, %v1625_v13  ;;  %1632 = vpow2.f32 %v1497_v3  ;;  %v741_v17 = vpop.xlane.xlu1 %740  ;;  %v924_v20 = vsub.f32 1.0, %v923_v10  ;;  %vm869_vm6 = vmor %vm867_vm15, %vm868_vm2  ;;  %vm987_vm8 = vweird.f32 %v2387_v6 }
 0x1d0   : > { %v784_v21 = vadd.f32 %v2346_v30, %v741_v17  ;;  %v777_v22 = vpop.xlane.xlu2 %776  ;;  %v762_v23 = vpop.xlane.xlu0 %761  ;;  %v864_v58 = vsub.f32 1.0, %v863_v14  ;;  %vm992_vm15 = vcmp.eq.f32.partialorder %v991_v60, 8.507059e+37 }
 0x1d1   : > { %1634 = vrcp.f32 %v2406_v16  ;;  %v796_v63 = vadd.f32 %v2346_v30, %v777_v22  ;;  %v791_v32 = vadd.f32 %v2346_v30, %v762_v23  ;;  %v925_v33 = vmul.f32 %v2385_v5, %v924_v20 }
 0x1d2   : > { %v1627_v34 = vpop.eup %1626  ;;  %v1498_v35 = vmul.f32 -1.442695, %v784_v21  ;;  %v865_v36 = vmul.f32 %v1623_v9, %v864_v58  ;;  %v1051_v54 = vand.u32 2147483647, %v2406_v16  ;;  %v1053_v58 = vand.u32 2147483648, %v2406_v16 }
 0x1d3   : > { %v1629_v38 = vpop.eup %1628  ;;  %v1510_v40 = vmul.f32 -1.442695, %v796_v63  ;;  %v1505_v57 = vmul.f32 -1.442695, %v791_v32  ;;  %v926_v59 = vadd.f32 %v2385_v5, %v925_v33  ;;  %v2455_v10 = vadd.f32 1.0, %v1627_v34 }
 0x1d4   : > { %v2426_v46 = vpop.eup %1630  ;;  %v866_v47 = vadd.f32 %v1623_v9, %v865_v36  ;;  %1636 = vpow2.f32 %v1498_v35  ;;  %v2440_v61 = vadd.f32 1.0, %v1629_v38  ;;  %v993_v33 = vand.u32 2147483648, %v2387_v6 }
 0x1d5   : > { %v1633_v56 = vpop.eup %1632  ;;  %v983_v3 = vmul.f32 %v2426_v46, %v2387_v6  ;;  %1638 = vpow2.f32 %v1510_v40  ;;  %v930_v21 = vsel %vm2448_vm7, %v2385_v5, %v926_v59  ;;  %vm1047_vm9 = vweird.f32 %v2406_v16 }
 0x1d6   : > { %v2442_v62 = vadd.f32 1.0, %v1633_v56  ;;  %v870_v0 = vsel %vm869_vm6, %v1623_v9, %v866_v47  ;;  %v935_v35 = vsel %vm2417_vm3, %v934_v43, %v930_v21  ;;  %vm2477_vm11 = vcmp.eq.f32.partialorder %v1051_v54, 8.507059e+37 }
 0x1d7   : > { %v1635_v2 = vpop.eup %1634  ;;  %v765_v11 = vpop.xlane.xlu1 %764  ;;  %v875_v9 = vsel %vm2421_vm4, %v874_v50, %v870_v0  ;;  %v984_v38 = vsub.f32 1.0, %v983_v3  ;;  %v1054_v50 = vor.u32 1.1754944e-38, %v1053_v58  ;;  %vm988_vm13 = vweird.f32 %v2426_v46 }
 0x1d8   : > { %v1043_v13 = vmul.f32 %v1635_v2, %v2406_v16  ;;  %1640 = vrcp.f32 %v2442_v62  ;;  %v792_v52 = vadd.f32 %v2346_v30, %v765_v11  ;;  %v768_v14 = vpop.xlane.xlu2 %767  ;;  %v753_v15 = vpop.xlane.xlu0 %752  ;;  %v1128_v17 = vmul.f32 %v1112_v4, %v875_v9  ;;  %vm2514_vm14 = vmor %vm987_vm8, %vm988_vm13 }
 0x1d9   : > { %1642 = vpow2.f32 %v1505_v57  ;;  %v793_v19 = vadd.f32 %v2346_v30, %v768_v14  ;;  %v788_v20 = vadd.f32 %v2346_v30, %v753_v15  ;;  %vm1048_vm10 = vweird.f32 %v1635_v2 }
 0x1da   : > { %1644 = vrcp.f32 %v2440_v61  ;;  %v1506_v22 = vmul.f32 -1.442695, %v792_v52  ;;  %1146 = vperm.xlu1 %1601, %v1128_v17   ;;  %v1044_v23 = vsub.f32 1.0, %v1043_v13  ;;  %v1637_v31 = vpop.eup %1636  ;;  %vm1049_vm12 = vmor %vm1047_vm9, %vm1048_vm10  ;;  %v985_v37 = vmul.f32 %v2426_v46, %v984_v38 }
 0x1db   : > { %v1507_v63 = vmul.f32 -1.442695, %v793_v19  ;;  %v1502_v32 = vmul.f32 -1.442695, %v788_v20  ;;  %1646 = vrcp.f32 %v2455_v10  ;;  %v1639_v5 = vpop.eup %1638  ;;  %v2483_v42 = vadd.f32 1.0, %v1637_v31 }
 0x1dc   : > { %v1045_v34 = vmul.f32 %v1635_v2, %v1044_v23  ;;  %1648 = vpow2.f32 %v1506_v22  ;;  %v2494_v0 = vadd.f32 1.0, %v1639_v5  ;;  %v1132_v3 = vmul.f32 %v1114_v7, %v935_v35 }
 0x1dd   : > { %1650 = vpow2.f32 %v1507_v63  ;;  %v986_v52 = vadd.f32 %v2426_v46, %v985_v37  ;;  %v1116_v17 = vperm.slane %v2433_v53, 0  ;;  %v994_v23 = vor.u32 1.1754944e-38, %v993_v33 }
 0x1de   : > { %v2481_v40 = vpop.eup %1640  ;;  %v1046_v47 = vadd.f32 %v1635_v2, %v1045_v34  ;;  %1652 = vpow2.f32 %v1502_v32  ;;  %v560_v5 = vsub.f32 %v2147_v48, %v2400_v12  ;;  %vm882_vm2 = vweird.f32 %v2442_v62 }
 0x1df   : > { %v1643_v56 = vpop.eup %1642  ;;  %v878_v57 = vmul.f32 %v2481_v40, %v2442_v62  ;;  %v744_v59 = vpop.xlane.xlu1 %743  ;;  %v990_v22 = vsel %vm2514_vm14, %v2426_v46, %v986_v52  ;;  %vm883_vm0 = vweird.f32 %v2481_v40  ;;  %v886_v36 = vand.u32 2147483647, %v2442_v62 }
 0x1e0   : > { %v2492_v43 = vpop.eup %1644  ;;  %v2496_v1 = vadd.f32 1.0, %v1643_v56  ;;  %v780_v54 = vpop.xlane.xlu0 %779  ;;  %v1050_v11 = vsel %vm1049_vm12, %v1635_v2, %v1046_v47  ;;  %v785_v9 = vadd.f32 %v2346_v30, %v744_v59  ;;  %v995_v35 = vsel %vm992_vm15, %v994_v23, %v990_v22  ;;  %vm2541_vm3 = vmor %vm882_vm2, %vm883_vm0 }
 0x1e1   : > { %v797_v16 = vadd.f32 %v2346_v30, %v780_v54  ;;  %v1055_v13 = vsel %vm2477_vm11, %v1054_v50, %v1050_v11  ;;  %v2505_v14 = vpop.eup %1646  ;;  %v879_v19 = vsub.f32 1.0, %v878_v57  ;;  %v938_v21 = vmul.f32 %v2492_v43, %v2440_v61 }
 0x1e2   : > { %1654 = vrcp.f32 %v2496_v1  ;;  %1166 = vperm.xlu1 %1601, %v1132_v3   ;;  %v1140_v15 = vmul.f32 %v1118_v51, %v1055_v13  ;;  %v1649_v20 = vpop.eup %1648  ;;  %v1499_v34 = vmul.f32 -1.442695, %v785_v9  ;;  %v888_v12 = vand.u32 2147483648, %v2442_v62 }
 0x1e3   : > { %1656 = vrcp.f32 %v2483_v42  ;;  %v1651_v58 = vpop.eup %1650  ;;  %v1511_v31 = vmul.f32 -1.442695, %v797_v16  ;;  %v880_v63 = vmul.f32 %v2481_v40, %v879_v19  ;;  %v2537_v6 = vadd.f32 1.0, %v1649_v20 }
 0x1e4   : > { %1658 = vrcp.f32 %v2494_v0  ;;  %1206 = vperm.xlu0 %1602, %v1140_v15   ;;  %v1653_v32 = vpop.eup %1652  ;;  %v2539_v60 = vadd.f32 1.0, %v1651_v58  ;;  %v939_v50 = vsub.f32 1.0, %v938_v21  ;;  %v1136_v59 = vmul.f32 %v1116_v17, %v995_v35 }
 0x1e5   : > { %v2532_v46 = vadd.f32 1.0, %v1653_v32  ;;  %v881_v33 = vadd.f32 %v2481_v40, %v880_v63  ;;  %1660 = vpow2.f32 %v1511_v31  ;;  %v889_v62 = vor.u32 1.1754944e-38, %v888_v12 }
 0x1e6   : > { %v940_v11 = vmul.f32 %v2492_v43, %v939_v50  ;;  %vm887_vm4 = vcmp.eq.f32.partialorder %v886_v36, 8.507059e+37  ;;  %vm943_vm5 = vweird.f32 %v2492_v43  ;;  %v946_v16 = vand.u32 2147483647, %v2440_v61 }
 0x1e7   : > { %v756_v38 = vpop.xlane.xlu1 %755  ;;  %v885_v37 = vsel %vm2541_vm3, %v2481_v40, %v881_v33  ;;  %1662 = vrcp.f32 %v2532_v46  ;;  %v948_v52 = vand.u32 2147483648, %v2440_v61  ;;  %v1058_v2 = vmul.f32 %v2505_v14, %v2455_v10 }
 0x1e8   : > { %v2546_v56 = vpop.eup %1654  ;;  %v789_v57 = vadd.f32 %v2346_v30, %v756_v38  ;;  %v890_v40 = vsel %vm887_vm4, %v889_v62, %v885_v37  ;;  %v941_v13 = vadd.f32 %v2492_v43, %v940_v11  ;;  %1664 = vpow2.f32 %v1499_v34 }
 0x1e9   : > { %v2554_v54 = vpop.eup %1656  ;;  %v998_v3 = vmul.f32 %v2546_v56, %v2496_v1  ;;  %v1129_v19 = vmul.f32 %v1112_v4, %v890_v40  ;;  %vm942_vm6 = vweird.f32 %v2440_v61  ;;  %1666 = vrcp.f32 %v2537_v6 }
 0x1ea   : > { %v2560_v9 = vpop.eup %1658  ;;  %v1503_v30 = vmul.f32 -1.442695, %v789_v57  ;;  %1186 = vperm.xlu1 %1601, %v1136_v59   ;;  %v893_v20 = vmul.f32 %v2554_v54, %v2483_v42  ;;  %v2578_v22 = vmul.f32 -0.1, %v560_v5  ;;  %vm2580_vm7 = vmor %vm942_vm6, %vm943_vm5  ;;  %1668 = vrcp.f32 %v2539_v60 }
 0x1eb   : > { %v999_v15 = vsub.f32 1.0, %v998_v3  ;;  %v2575_v21 = vmul.f32 %v2560_v9, %v2494_v0  ;;  %v1661_v58 = vpop.eup %1660  ;;  %1151 = vperm.xlu2 %1603, %v1129_v19   ;;  %v945_v4 = vsel %vm2580_vm7, %v2492_v43, %v941_v13  ;;  %vm1003_vm8 = vweird.f32 %v2546_v56 }
 0x1ec   : > { %1670 = vpow2.f32 %v1503_v30  ;;  %vm947_vm9 = vcmp.eq.f32.partialorder %v946_v16, 8.507059e+37  ;;  %v949_v63 = vor.u32 1.1754944e-38, %v948_v52  ;;  %v1006_v32 = vand.u32 2147483647, %v2496_v1 }
 0x1ed   : > { %v1000_v61 = vmul.f32 %v2546_v56, %v999_v15  ;;  %v2590_v31 = vpop.eup %1662  ;;  %vm1002_vm10 = vweird.f32 %v2496_v1  ;;  %v1008_v5 = vand.u32 2147483648, %v2496_v1  ;;  %v1059_v35 = vsub.f32 1.0, %v1058_v2 }
 0x1ee   : > { %v2596_v33 = vadd.f32 1.0, %v1661_v58  ;;  %v950_v43 = vsel %vm947_vm9, %v949_v63, %v945_v4  ;;  %vm2598_vm11 = vmor %vm1002_vm10, %vm1003_vm8  ;;  %vm1063_vm12 = vweird.f32 %v2505_v14  ;;  %v1066_v38 = vand.u32 2147483647, %v2455_v10  ;;  %v2604_v47 = vpop.eup %1664  ;;  %v485_v4 = vld [vmem:[%s2940_s11 + $0x5] sm:$0x1] }
 0x1ef   : > { %v1001_v34 = vadd.f32 %v2546_v56, %v1000_v61  ;;  %v1009_v50 = vor.u32 1.1754944e-38, %v1008_v5  ;;  %v1060_v1 = vmul.f32 %v2505_v14, %v1059_v35  ;;  %v1068_v57 = vand.u32 2147483648, %v2455_v10  ;;  %v2611_v59 = vpop.eup %1666  ;;  %v487_v35 = vld [vmem:[%s2940_s11 + $0x7] sm:$0x1] }
 0x1f0   : > { %v953_v37 = vmul.f32 %v2590_v31, %v2532_v46  ;;  %vm1007_vm13 = vcmp.eq.f32.partialorder %v1006_v32, 8.507059e+37  ;;  %v894_v3 = vsub.f32 1.0, %v893_v20  ;;  %vm897_vm14 = vweird.f32 %v2483_v42  ;;  %v2616_v62 = vpop.eup %1668 }
 0x1f1   : > { %v1005_v12 = vsel %vm2598_vm11, %v2546_v56, %v1001_v34  ;;  %v1133_v11 = vmul.f32 %v1114_v7, %v950_v43  ;;  %v1061_v30 = vadd.f32 %v2505_v14, %v1060_v1  ;;  %vm1062_vm15 = vweird.f32 %v2455_v10 }
 0x1f2   : > { %v1010_v56 = vsel %vm1007_vm13, %v1009_v50, %v1005_v12  ;;  %v2622_v16 = vpop.eup %1670  ;;  %vm1064_vm0 = vmor %vm1062_vm15, %vm1063_vm12  ;;  %v1069_v13 = vor.u32 1.1754944e-38, %v1068_v57  ;;  %v895_v52 = vmul.f32 %v2554_v54, %v894_v3  ;;  %vm898_vm2 = vweird.f32 %v2554_v54 }
 0x1f3   : > { %v1137_v40 = vmul.f32 %v1116_v17, %v1010_v56  ;;  %1171 = vperm.xlu2 %1603, %v1133_v11   ;;  %v1065_v7 = vsel %vm1064_vm0, %v2505_v14, %v1061_v30  ;;  %vm1067_vm3 = vcmp.eq.f32.partialorder %v1066_v38, 8.507059e+37  ;;  %vm2633_vm4 = vmor %vm897_vm14, %vm898_vm2  ;;  %v901_v17 = vand.u32 2147483647, %v2483_v42 }
 0x1f4   : > { %v903_v15 = vand.u32 2147483648, %v2483_v42  ;;  %v1028_v2 = vmul.f32 %v2616_v62, %v2539_v60  ;;  %v1070_v19 = vsel %vm1067_vm3, %v1069_v13, %v1065_v7  ;;  %v896_v20 = vadd.f32 %v2554_v54, %v895_v52 }
 0x1f5   : > { %1191 = vperm.xlu0 %1602, %v1137_v40   ;;  %v954_v23 = vsub.f32 1.0, %v953_v37  ;;  %1672 = vrcp.f32 %v2596_v33  ;;  %vm902_vm5 = vcmp.eq.f32.partialorder %v901_v17, 8.507059e+37  ;;  %v1113_v58 = vperm.slane %v2239_v28, 0 }
 0x1f6   : > { %v904_v14 = vor.u32 1.1754944e-38, %v903_v15  ;;  %v900_v42 = vsel %vm2633_vm4, %v2554_v54, %v896_v20  ;;  %vm958_vm6 = vweird.f32 %v2590_v31  ;;  %v961_v63 = vand.u32 2147483647, %v2532_v46 }
 0x1f7   : > { %v955_v61 = vmul.f32 %v2590_v31, %v954_v23  ;;  %v1141_v32 = vmul.f32 %v1118_v51, %v1070_v19  ;;  %v963_v5 = vand.u32 2147483648, %v2532_v46  ;;  %vm477_vm7 = vcmp.eq.s32.totalorder %v2134_v44, 5 }
 0x1f8   : > { %v905_v34 = vsel %vm902_vm5, %v904_v14, %v900_v42  ;;  %vm957_vm8 = vweird.f32 %v2532_v46  ;;  %v1115_v43 = vperm.slane %v2270_v41, 0  ;;  %v494_v36 = vsel %vm477_vm7, %v2147_v48, %v485_v4 }
 0x1f9   : > { %v956_v54 = vadd.f32 %v2590_v31, %v955_v61  ;;  %v1130_v51 = vmul.f32 %v1113_v58, %v905_v34  ;;  %vm959_vm9 = vmor %vm957_vm8, %vm958_vm6  ;;  %v964_v38 = vor.u32 1.1754944e-38, %v963_v5  ;;  %503 = vst.msk [vmem:[%s2940_s11 + $0x5] sm:$0x1] %vm497_vm1, %v494_v36  ;;  %v580_v12 = vmul.f32 1.442695, %v2578_v22 }
 0x1fa   : > { %vm479_vm10 = vcmp.eq.s32.totalorder %v2134_v44, 7  ;;  %vm962_vm11 = vcmp.eq.f32.partialorder %v961_v63, 8.507059e+37  ;;  %v1074_v1 = vsub.f32 1.0, %v2575_v21  ;;  %vm1077_vm12 = vweird.f32 %v2494_v0 }
 0x1fb   : > { %v960_v46 = vsel %vm959_vm9, %v2590_v31, %v956_v54  ;;  %v496_v50 = vsel %vm479_vm10, %v2147_v48, %v487_v35  ;;  %v2675_v57 = vpop.eup %1672  ;;  %1211 = vperm.xlu2 %1603, %v1141_v32   ;;  %1674 = vpow2.f32 %v580_v12  ;;  %vm1078_vm13 = vweird.f32 %v2560_v9 }
 0x1fc   : > { %v965_v37 = vsel %vm962_vm11, %v964_v38, %v960_v46  ;;  %505 = vst.msk [vmem:[%s2940_s11 + $0x7] sm:$0x1] %vm497_vm1, %v496_v50  ;;  %v2684_v44 = vadd.f32 1.0, %v2604_v47  ;;  %v1075_v22 = vmul.f32 %v2560_v9, %v1074_v1  ;;  %v1083_v31 = vand.u32 2147483648, %v2494_v0  ;;  %vm2692_vm14 = vmor %vm1077_vm12, %vm1078_vm13 }
 0x1fd   : > { %1156 = vperm.xlu0 %1602, %v1130_v51   ;;  %v1134_v21 = vmul.f32 %v1115_v43, %v965_v37  ;;  %v1081_v3 = vand.u32 2147483647, %v2494_v0  ;;  %v1013_v47 = vmul.f32 %v2611_v59, %v2537_v6  ;;  %v1029_v30 = vsub.f32 1.0, %v1028_v2 }
 0x1fe   : > { %v1076_v11 = vadd.f32 %v2560_v9, %v1075_v22  ;;  %1676 = vrcp.f32 %v2684_v44  ;;  %v1084_v13 = vor.u32 1.1754944e-38, %v1083_v31  ;;  %v1088_v17 = vmul.f32 %v2675_v57, %v2596_v33 }
 0x1ff   : > { %1176 = vperm.xlu1 %1601, %v1134_v21   ;;  %vm1082_vm15 = vcmp.eq.f32.partialorder %v1081_v3, 8.507059e+37  ;;  %v1030_v10 = vmul.f32 %v2616_v62, %v1029_v30  ;;  %v2710_v15 = vadd.f32 1.0, %v2622_v16  ;;  %v1014_v23 = vsub.f32 1.0, %v1013_v47 }
 0x200   : > { %v527_v40 = vld [vmem:[%s2940_s11 + $0x5] sm:$0x1]  ;;  %v1080_v7 = vsel %vm2692_vm14, %v2560_v9, %v1076_v11  ;;  %vm1032_vm2 = vweird.f32 %v2539_v60  ;;  %vm1033_vm3 = vweird.f32 %v2616_v62  ;;  %v1036_v34 = vand.u32 2147483647, %v2539_v60 }
 0x201   : > { %v1675_v52 = vpop.eup %1674  ;;  %v561_v0 = vsub.f32 %v2147_v48, %v527_v40  ;;  %v1085_v42 = vsel %vm1082_vm15, %v1084_v13, %v1080_v7  ;;  %v1031_v63 = vadd.f32 %v2616_v62, %v1030_v10  ;;  %v1038_v5 = vand.u32 2147483648, %v2539_v60  ;;  %vm2730_vm5 = vmor %vm1032_vm2, %vm1033_vm3 }
 0x202   : > { %v592_v2 = vmul.f32 %v1675_v52, %v2433_v53  ;;  %v1089_v35 = vsub.f32 1.0, %v1088_v17  ;;  %vm537_vm4 = vcmp.gt.f32.partialorder %v527_v40, %v2230_v18  ;;  %vm1093_vm6 = vweird.f32 %v2675_v57 }
 0x203   : > { %v529_v19 = vld [vmem:[%s2940_s11 + $0x7] sm:$0x1]  ;;  %v569_v20 = vmul.f32 -0.1, %v561_v0  ;;  %v1096_v12 = vand.u32 2147483647, %v2596_v33  ;;  %v1035_v50 = vsel %vm2730_vm5, %v2616_v62, %v1031_v63  ;;  %vm1092_vm7 = vweird.f32 %v2596_v33 }
 0x204   : > { %vm539_vm0 = vcmp.gt.f32.partialorder %v529_v19, %v2230_v18  ;;  %v563_v9 = vsub.f32 %v2147_v48, %v529_v19  ;;  %v1288_v14 = vperm.slane %v592_v2, 0  ;;  %v2725_v32 = vpop.eup %1676  ;;  %v1090_v38 = vmul.f32 %v2675_v57, %v1089_v35  ;;  %vm1094_vm9 = vmor %vm1092_vm7, %vm1093_vm6 }
 0x205   : > { %v2719_v4 = vsel %vm539_vm0, 1.0, %v1791_v26  ;;  %v582_v16 = vmul.f32 1.442695, %v569_v20  ;;  %v1098_v46 = vand.u32 2147483648, %v2596_v33  ;;  %v908_v60 = vmul.f32 %v2725_v32, %v2684_v44 }
 0x206   : > { %v1119_v61 = vperm.slane %v2719_v4, 0  ;;  %1309 = vperm.xlu0 %1602, %v1288_v14   ;;  %v571_v54 = vmul.f32 -0.1, %v563_v9  ;;  %v1015_v18 = vmul.f32 %v2611_v59, %v1014_v23  ;;  %v2746_v1 = vsel %vm537_vm4, 1.0, %v1791_v26 }
 0x207   : > { %1678 = vpow2.f32 %v582_v16  ;;  %v1039_v37 = vor.u32 1.1754944e-38, %v1038_v5  ;;  %v1091_v21 = vadd.f32 %v2675_v57, %v1090_v38  ;;  %vm1037_vm8 = vcmp.eq.f32.partialorder %v1036_v34, 8.507059e+37 }
 0x208   : > { %v1142_v36 = vmul.f32 %v1119_v61, %v1085_v42  ;;  %1680 = vrcp.f32 %v2710_v15  ;;  %v1099_v22 = vor.u32 1.1754944e-38, %v1098_v46  ;;  %v586_v31 = vmul.f32 1.442695, %v571_v54 }
 0x209   : > { %vm1017_vm10 = vweird.f32 %v2537_v6  ;;  %v1040_v3 = vsel %vm1037_vm8, %v1039_v37, %v1035_v50  ;;  %v1095_v11 = vsel %vm1094_vm9, %v2675_v57, %v1091_v21  ;;  %vm1097_vm11 = vcmp.eq.f32.partialorder %v1096_v12, 8.507059e+37 }
 0x20a   : > { %1216 = vperm.xlu1 %1601, %v1142_v36   ;;  %vm1018_vm12 = vweird.f32 %v2611_v59  ;;  %v1117_v26 = vperm.slane %v2746_v1, 0  ;;  %v1100_v62 = vsel %vm1097_vm11, %v1099_v22, %v1095_v11  ;;  %1682 = vpow2.f32 %v586_v31 }
 0x20b   : > { %v1016_v33 = vadd.f32 %v2611_v59, %v1015_v18  ;;  %v1143_v30 = vmul.f32 %v1119_v61, %v1100_v62  ;;  %v909_v40 = vsub.f32 1.0, %v908_v60  ;;  %v1023_v52 = vand.u32 2147483648, %v2537_v6  ;;  %vm1019_vm13 = vmor %vm1017_vm10, %vm1018_vm12 }
 0x20c   : > { %v1139_v0 = vmul.f32 %v1117_v26, %v1040_v3  ;;  %v1021_v57 = vand.u32 2147483647, %v2537_v6  ;;  %v562_v23 = vsub.f32 %v2147_v48, %v2376_v55  ;;  %vm913_vm15 = vweird.f32 %v2725_v32 }
 0x20d   : > { %v1679_v56 = vpop.eup %1678  ;;  %v1020_v17 = vsel %vm1019_vm13, %v2611_v59, %v1016_v33  ;;  %v910_v2 = vmul.f32 %v2725_v32, %v909_v40  ;;  %v1024_v20 = vor.u32 1.1754944e-38, %v1023_v52  ;;  %v596_v59 = vsel %vm497_vm1, %v2236_v27, 0.0 }
 0x20e   : > { %v593_v47 = vmul.f32 %v1679_v56, %v2746_v1  ;;  %v1681_v13 = vpop.eup %1680  ;;  %1221 = vperm.xlu0 %1602, %v1143_v30   ;;  %vm1022_vm14 = vcmp.eq.f32.partialorder %v1021_v57, 8.507059e+37  ;;  %v597_v61 = vsel %vm497_vm1, %v2239_v28, 0.0  ;;  %v918_v63 = vand.u32 2147483648, %v2684_v44 }
 0x20f   : > { %v968_v10 = vmul.f32 %v1681_v13, %v2710_v15  ;;  %v1025_v14 = vsel %vm1022_vm14, %v1024_v20, %v1020_v17  ;;  %v911_v6 = vadd.f32 %v2725_v32, %v910_v2  ;;  %vm912_vm0 = vweird.f32 %v2684_v44  ;;  %v1689_v17 = vld [vmem:[%s2939_s10] sm:$0xff] }
 0x210   : > { %v1289_v7 = vperm.slane %v593_v47, 0  ;;  %v1683_v19 = vpop.eup %1682  ;;  %v1138_v34 = vmul.f32 %v1117_v26, %v1025_v14  ;;  %v916_v48 = vand.u32 2147483647, %v2684_v44  ;;  %v570_v55 = vmul.f32 -0.1, %v562_v23  ;;  %vm914_vm2 = vmor %vm912_vm0, %vm913_vm15 }
 0x211   : > { %v595_v9 = vmul.f32 %v1683_v19, %v2719_v4  ;;  %v969_v16 = vsub.f32 1.0, %v968_v10  ;;  %v598_v5 = vadd.f32 %v597_v61, %v596_v59  ;;  %v915_v35 = vsel %vm914_vm2, %v2725_v32, %v911_v6  ;;  %v2815_v6 = vld [vmem:[%s2103_s15] sm:$0xff]  ;;  %v2820_v59 = vld [vmem:[%s2103_s15 + $0x8] sm:$0xff] }
 0x212   : > { %1201 = vperm.xlu1 %1601, %v1139_v0   ;;  %1313 = vperm.xlu2 %1603, %v1289_v7   ;;  %v599_v27 = vsel %vm497_vm1, %v2273_v45, 0.0  ;;  %v919_v36 = vor.u32 1.1754944e-38, %v918_v63  ;;  %vm917_vm3 = vcmp.eq.f32.partialorder %v916_v48, 8.507059e+37  ;;  %v584_v38 = vmul.f32 1.442695, %v570_v55  ;;  %v1693_v61 = vld [vmem:[%s2939_s10 + $0x8] sm:$0xff] }
 0x213   : > { %v1291_v42 = vperm.slane %v595_v9, 0  ;;  %v970_v54 = vmul.f32 %v1681_v13, %v969_v16  ;;  %v600_v12 = vadd.f32 %v599_v27, %v598_v5  ;;  %vm973_vm4 = vweird.f32 %v1681_v13  ;;  %v1690_v9 = vld [vmem:[%s2939_s10 + $0x20] sm:$0xff]  ;;  %v1695_v5 = vld [vmem:[%s2939_s10 + $0x30] sm:$0xff] }
 0x214   : > { %v920_v51 = vsel %vm917_vm3, %v919_v36, %v915_v35  ;;  %v601_v44 = vsel %vm497_vm1, %v2270_v41, 0.0  ;;  %v978_v60 = vand.u32 2147483648, %v2710_v15  ;;  %vm972_vm5 = vweird.f32 %v2710_v15 }
 0x215   : > { %v971_v46 = vadd.f32 %v1681_v13, %v970_v54  ;;  %v1131_v18 = vmul.f32 %v1113_v58, %v920_v51  ;;  %v976_v32 = vand.u32 2147483647, %v2710_v15  ;;  %vm974_vm6 = vmor %vm972_vm5, %vm973_vm4  ;;  %1684 = vpow2.f32 %v584_v38 }
 0x216   : > { %v602_v45 = vadd.f32 %v601_v44, %v600_v12  ;;  %v603_v37 = vsel %vm497_vm1, %v2433_v53, 0.0  ;;  %v979_v21 = vor.u32 1.1754944e-38, %v978_v60  ;;  %v605_v28 = vsel %vm497_vm1, %v2746_v1, 0.0  ;;  %v1696_v12 = vld [vmem:[%s2939_s10 + $0x28] sm:$0xff] }
 0x217   : > { %v975_v50 = vsel %vm974_vm6, %v1681_v13, %v971_v46  ;;  %vm977_vm7 = vcmp.eq.f32.partialorder %v976_v32, 8.507059e+37  ;;  %v607_v3 = vsel %vm497_vm1, %v2391_v8, 0.0  ;;  %v609_v56 = vsel %vm497_vm1, %v2719_v4, 0.0 }
 0x218   : > { %v980_v22 = vsel %vm977_vm7, %v979_v21, %v975_v50  ;;  %v604_v31 = vadd.f32 %v603_v37, %v602_v45  ;;  %v1261_v63 = vsub.f32 %v1693_v61, %v2820_v59  ;;  %v1264_v36 = vsub.f32 %v1690_v9, %v2815_v6 }
 0x219   : > { %v1135_v15 = vmul.f32 %v1115_v43, %v980_v22  ;;  %v1265_v46 = vsub.f32 %v1696_v12, %v2820_v59 }
 0x21a   : > { %1321 = vperm.xlu1 %1601, %v1291_v42   ;;  %1196 = vperm.xlu2 %1603, %v1138_v34   ;;  %v606_v11 = vadd.f32 %v605_v28, %v604_v31  ;;  %v1260_v42 = vsub.f32 %v1689_v17, %v2815_v6  ;;  %v1694_v34 = vld [vmem:[%s2939_s10 + $0x18] sm:$0xff]  ;;  %v1325_v51 = vmul.f32 %v2339_v29, %v1261_v63 }
 0x21b   : > { %v1685_v58 = vpop.eup %1684  ;;  %v1263_v48 = vsub.f32 %v1694_v34, %v2820_v59  ;;  %v1328_v37 = vmul.f32 %v2337_v25, %v1264_v36  ;;  %v1329_v22 = vmul.f32 %v2337_v25, %v1265_v46  ;;  %v1698_v31 = vld [vmem:[%s2939_s10 + $0x38] sm:$0xff]  ;;  %v1700_v25 = vld [vmem:[%s2939_s10 + $0x48] sm:$0xff] }
 0x21c   : > { %v594_v53 = vmul.f32 %v1685_v58, %v2391_v8  ;;  %v608_v26 = vadd.f32 %v607_v3, %v606_v11  ;;  %v1324_v54 = vmul.f32 %v2339_v29, %v1260_v42  ;;  %v1266_v29 = vsub.f32 %v1695_v5, %v2815_v6  ;;  %v1699_v11 = vld [vmem:[%s2939_s10 + $0x50] sm:$0xff]  ;;  %v1705_v36 = vld [vmem:[%s2939_s10 + $0x78] sm:$0xff] }
 0x21d   : > { %v1327_v38 = vmul.f32 %v2335_v24, %v1263_v48  ;;  %v1267_v28 = vsub.f32 %v1698_v31, %v2820_v59 }
 0x21e   : > { %v610_v62 = vadd.f32 %v609_v56, %v608_v26  ;;  %v1290_v47 = vperm.slane %v594_v53, 0  ;;  %v1269_v26 = vsub.f32 %v1700_v25, %v2820_v59 }
 0x21f   : > { %v1347_v21 = vadd.f32 %v1327_v38, %v1325_v51  ;;  %v1275_v51 = vsub.f32 %v1705_v36, %v2820_v59 }
 0x220   : > { %v1102_v33 = vmax.f32 %v610_v62, 1.0  ;;  %vm1360_vm8 = vcmp.gt.f32.partialorder %v610_v62, 1.5 }
 0x221   : > { %v1361_v30 = vsel %vm1360_vm8, 1, %v1790_v49  ;;  %v1688_v49 = vld [vmem:[%s2939_s10 + $0x10] sm:$0xff] }
 0x222   : > { %1161 = vperm.xlu2 %1603, %v1131_v18   ;;  %1686 = vrcp.f32 %v1102_v33  ;;  %v1262_v16 = vsub.f32 %v1688_v49, %v2815_v6  ;;  %v1697_v18 = vld [vmem:[%s2939_s10 + $0x40] sm:$0xff] }
 0x223   : > { %v1268_v53 = vsub.f32 %v1697_v18, %v2815_v6 }
 0x224   : > { %v1326_v27 = vmul.f32 %v2335_v24, %v1262_v16 }
 0x226   : > { %v1340_v50 = vadd.f32 %v1326_v27, %v1324_v54 }
 0x228   : > { %v1687_v1 = vpop.eup %1686  ;;  %v1341_v62 = vadd.f32 %v1340_v50, %v1328_v37 }
 0x229   : > { %1543 = vpush %v1687_v1  ;;  %v1348_v1 = vadd.f32 %v1347_v21, %v1329_v22 }
 0x22a   : > { %1181 = vperm.xlu2 %1603, %v1135_v15   ;;  %1545 = vpush %v1361_v30  ;;  %v1331_v30 = vmul.f32 %v2364_v39, %v1267_v28 }
 0x232   : > { %1317 = vperm.xlu2 %1603, %v1290_v47   ;;  %v1330_v47 = vmul.f32 %v2364_v39, %v1266_v29  ;;  %v1702_v39 = vld [vmem:[%s2939_s10 + $0x58] sm:$0xff] }
 0x245   : > { %v1152_v41 = vpop.permute.xlu2 %1151 }
 0x246   : > { %v1225_v3 = vmul.f32 %v1693_v61, %v1152_v41  ;;  %v1703_v61 = vld [vmem:[%s2939_s10 + $0x70] sm:$0xff] }
 0x24c   : > { %v1147_v43 = vpop.permute.xlu1 %1146 }
 0x24d   : > { %v1172_v40 = vpop.permute.xlu2 %1171  ;;  %v1224_v2 = vmul.f32 %v1689_v17, %v1147_v43 }
 0x24e   : > { %v1229_v43 = vmul.f32 %v1696_v12, %v1172_v40  ;;  %v1271_v40 = vsub.f32 %v1702_v39, %v2820_v59 }
 0x254   : > { %v1167_v4 = vpop.permute.xlu1 %1166 }
 0x255   : > { %v2799_v8 = vpop.permute.xlu2 %1211  ;;  %v1228_v23 = vmul.f32 %v1690_v9, %v1167_v4  ;;  %v1349_v9 = vadd.f32 %v1348_v1, %v1331_v30 }
 0x256   : > { %v2797_v13 = vpop.permute.xlu0 %1206 }
 0x25a   : > { %s2875_s15 = spop %1543 }
 0x25b   : > { %s1546_s2 = spop %1545 }
 0x25c   : > { %v1187_v0 = vpop.permute.xlu1 %1186 }
 0x25d   : > { %v1232_v32 = vmul.f32 %v1697_v18, %v1187_v0  ;;  %v1701_v0 = vld [vmem:[%s2939_s10 + $0x60] sm:$0xff] }
 0x267   : > { %v2801_v52 = vpop.permute.xlu0 %1191 }
 0x268   : > { %v1233_v42 = vmul.f32 %v1700_v25, %v2801_v52  ;;  %v1704_v52 = vld [vmem:[%s2939_s10 + $0x68] sm:$0xff] }
 0x26c   : > { %v2803_v7 = vpop.permute.xlu2 %1313 }
 0x26d   : > { %v1335_v12 = vmul.f32 %v2803_v7, %v1271_v40 }
 0x26f   : > { %v1157_v57 = vpop.permute.xlu0 %1156 }
 0x270   : > { %v1226_v10 = vmul.f32 %v1688_v49, %v1157_v57  ;;  %v1236_v57 = vmul.f32 %v1701_v0, %v2797_v13 }
 0x271   : > { %v1177_v19 = vpop.permute.xlu1 %1176 }
 0x272   : > { %v1240_v20 = vadd.f32 %v1226_v10, %v1224_v2  ;;  %v1230_v35 = vmul.f32 %v1695_v5, %v1177_v19  ;;  %v1342_v2 = vadd.f32 %v1341_v62, %v1330_v47  ;;  %v1272_v5 = vsub.f32 %v1701_v0, %v2815_v6 }
 0x274   : > { %v1197_v14 = vpop.permute.xlu2 %1196  ;;  %v1241_v55 = vadd.f32 %v1240_v20, %v1228_v23  ;;  %v1270_v23 = vsub.f32 %v1699_v11, %v2815_v6 }
 0x275   : > { %v1234_v56 = vmul.f32 %v1699_v11, %v1197_v14 }
 0x276   : > { %v1242_v44 = vadd.f32 %v1241_v55, %v1230_v35  ;;  %v1274_v55 = vsub.f32 %v1703_v61, %v2815_v6  ;;  %v1273_v35 = vsub.f32 %v1704_v52, %v2820_v59  ;;  %v1334_v38 = vmul.f32 %v2803_v7, %v1270_v23 }
 0x278   : > { %v1243_v58 = vadd.f32 %v1242_v44, %v1232_v32  ;;  %v1310_v15 = vpop.permute.xlu0 %1309  ;;  %v1237_v44 = vmul.f32 %v1704_v52, %v2799_v8 }
 0x279   : > { %v1332_v10 = vmul.f32 %v1310_v15, %v1268_v53  ;;  %v1333_v17 = vmul.f32 %v1310_v15, %v1269_v26  ;;  %v1363_v53 = vstv %s1546_s2 }
 0x27a   : > { %v1244_v41 = vadd.f32 %v1243_v58, %v1234_v56  ;;  %vm1364_vm1 = vcmp.eq.s32.totalorder %v1363_v53, 1 }
 0x27b   : > { %v1350_v48 = vadd.f32 %v1349_v9, %v1333_v17 }
 0x27c   : > { %v1217_v60 = vpop.permute.xlu1 %1216  ;;  %v1162_v45 = vpop.permute.xlu2 %1161  ;;  %v1245_v14 = vadd.f32 %v1244_v41, %v1236_v57 }
 0x27d   : > { %v1227_v24 = vmul.f32 %v1694_v34, %v1162_v45  ;;  %v1238_v63 = vmul.f32 %v1703_v61, %v1217_v60  ;;  %v1343_v34 = vadd.f32 %v1342_v2, %v1332_v10  ;;  %v1256_v60 = vstv %s2875_s15 }
 0x27e   : > { %v1351_v37 = vadd.f32 %v1350_v48, %v1335_v12 }
 0x27f   : > { %v1247_v33 = vadd.f32 %v1227_v24, %v1225_v3  ;;  %v1246_v46 = vadd.f32 %v1245_v14, %v1238_v63  ;;  %v1344_v50 = vadd.f32 %v1343_v34, %v1334_v38 }
 0x280   : > { %v1222_v27 = vpop.permute.xlu0 %1221 }
 0x281   : > { %v1248_v19 = vadd.f32 %v1247_v33, %v1229_v43  ;;  %v1239_v29 = vmul.f32 %v1705_v36, %v1222_v27  ;;  %v1258_v58 = vmul.f32 %v1256_v60, %v1246_v46 }
 0x283   : > { %v1356_v25 = vmul.f32 0.3, %v1258_v58 }
 0x284   : > { %v1202_v4 = vpop.permute.xlu1 %1201  ;;  %v1182_v49 = vpop.permute.xlu2 %1181 }
 0x285   : > { %v1231_v20 = vmul.f32 %v1698_v31, %v1182_v49  ;;  %v1235_v13 = vmul.f32 %v1702_v39, %v1202_v4 }
 0x287   : > { %v1249_v16 = vadd.f32 %v1248_v19, %v1231_v20 }
 0x289   : > { %v1250_v54 = vadd.f32 %v1249_v16, %v1233_v42 }
 0x28b   : > { %v1251_v18 = vadd.f32 %v1250_v54, %v1235_v13 }
 0x28c   : > { %v1322_v32 = vpop.permute.xlu1 %1321  ;;  %v1318_v45 = vpop.permute.xlu2 %1317 }
 0x28d   : > { %v1338_v24 = vmul.f32 %v1322_v32, %v1274_v55  ;;  %v1336_v21 = vmul.f32 %v1318_v45, %v1272_v5  ;;  %v1337_v22 = vmul.f32 %v1318_v45, %v1273_v35  ;;  %v1252_v31 = vadd.f32 %v1251_v18, %v1237_v44 }
 0x28e   : > { %v1339_v28 = vmul.f32 %v1322_v32, %v1275_v51 }
 0x28f   : > { %v1345_v7 = vadd.f32 %v1344_v50, %v1336_v21  ;;  %v1352_v3 = vadd.f32 %v1351_v37, %v1337_v22  ;;  %v1253_v15 = vadd.f32 %v1252_v31, %v1239_v29 }
 0x291   : > { %v1259_v8 = vmul.f32 %v1256_v60, %v1253_v15  ;;  %v1346_v11 = vadd.f32 %v1345_v7, %v1338_v24  ;;  %v1353_v56 = vadd.f32 %v1352_v3, %v1339_v28 }
 0x293   : > { %v1357_v26 = vmul.f32 0.3, %v1259_v8  ;;  %v1354_v62 = vmul.f32 0.7, %v1346_v11  ;;  %v1355_v47 = vmul.f32 0.7, %v1353_v56 }
 0x295   : > { %v1358_v33 = vadd.f32 %v1356_v25, %v1354_v62  ;;  %v1359_v1 = vadd.f32 %v1357_v26, %v1355_v47 }
 0x297   : > { %v1365_v30 = vsel %vm1364_vm1, %v1358_v33, %v2815_v6  ;;  %v1366_v41 = vsel %vm1364_vm1, %v1359_v1, %v2820_v59 }
 0x298   : > { %1367 = vst [vmem:[%s1931_s25] sm:$0xff] %v1365_v30 }
 0x299   : > { %1368 = vst [vmem:[%s1931_s25 + $0x8] sm:$0xff] %v1366_v41 }
 0x29a   : > { %1748 = shalt.err (!%p1745_p11)
}
 0x29b   : > { %s1792_s25 = smov 128   ;;  %s1793_s20 = smov 8  }
 0x29c   : > { %1551 = dma.vmem_to_hbm [thread:$0]  (%p1898_p5), %s1383_s0, 256, %s1385_s28, %s1370_s13, %s1792_s25, %s1792_s25, %s1793_s20  }
 0x29d PF: > { %p1563_p12 = scmp.ge.s32.totalorder %s1787_s24, 2  ;;  %s1411_s27 = sand.u32 1, %s1775_s21  }
 0x29e   : > { %s1412_s2 = scalar_lea.sflag [#allocation5], %s1411_s27 }
 0x29f   : > { %p1558_p13 = pnand %p1563_p12, %p1902_p6 }
 0x2a1   : > { %p1559_p0 = pneg %p1558_p13 }
 0x2a3   : > { %1770 = dma.done.wait (%p1559_p0), %s1412_s2, 256  }
 0x2a4   : > { %1772 = vsyncadd (%p1559_p0), %s1412_s2, 4294967040  ;;  %s2977_s24 = sld [smem:[#allocation11_spill]]  ;;  %s2980_s21 = smov %s1779_s22 }
 0x2a5   : > { %s2978_s26 = sld [smem:[#allocation10_spill]] }
 0x2a6   : > { %s2979_s23 = sld [smem:[#allocation12_spill]] }
 0x2aa   : > { %p25_p1 = scmp.ge.s32.totalorder %s2977_s24, 12  }
 0x2ab   : > { %s2981_s22 = smov %s2978_s26 }
 0x2ac   :  { %27 = sbr.rel (!%p25_p1) target bundleno = 9 (0x9), region = 117 }
 0x2b1   :  { %1418 = vsyncpa [#allocation5], 1 }
 0x2b2   :  { %1420 = vsyncpa [#allocation5 + $0x1], 1 }
 0x2b3   :  { %1421 = vsyncpa [#allocation6], 1 }
 0x2b4   :  { %1423 = vsyncpa [#allocation6 + $0x1], 1 }

</bundles_post_ra>
